<compile_context>
chip_gen: v7x
topology: tpu7x:2x2x1
jax: 0.10.0
libtpu: 0.0.40
codegen_flags: <defaults>
</compile_context>

<pallas_src>
import functools

import jax
import jax.numpy as jnp
from jax.experimental import pallas as pl
from jax.experimental.pallas import tpu as pltpu


# ---------------------------------------------------------------------------
# Generation-aware sizing helpers.
# ---------------------------------------------------------------------------
def _round_up(x, m):
    return ((x + m - 1) // m) * m


def _vmem_limit_bytes():
    # ~75% of physical VMEM, capped at 64 MiB.  v5e/v6e (128 MiB physical) -> 64 MiB;
    # v7x (64 MiB physical) -> 48 MiB, leaving headroom for Mosaic internal scratch.
    try:
        cap = int(pltpu.get_tpu_info().vmem_capacity_bytes)
    except Exception:
        cap = 128 * 1024 * 1024
    return min((cap * 3) // 4, 64 * 1024 * 1024)


def _pick_batch_blocks(B):
    # Split the (independent) per-row recurrences only when each half still feeds the MXU
    # with >= 128 rows and stays sublane-aligned.  This lets v7x's two TensorCores split a
    # large batch while never turning small/medium batches into extra serial grid steps on
    # single-TC v5e/v6e.
    if B % 16 == 0 and B // 2 >= 128:
        return 2
    return 1


def _pick_time_chunk(T, bb, I, hp, op, w_itemsize, budget):
    """Largest time chunk (divisor of T, multiple of 8 or == T, <= 32) fitting the budget."""
    # Resident (constant-index-map) weight/bias blocks + resident h carry; assume double
    # buffering for safety.
    resident = 2 * w_itemsize * (I * 3 * hp + hp * 3 * hp + hp * op)
    resident += 2 * 4 * (3 * hp + hp + op)          # f32 biases
    resident += 2 * 4 * bb * hp                     # resident hidden-state carry block

    def footprint(c):
        return (resident
                + 2 * 4 * bb * c * I                # x in-block (f32, double buffered)
                + 2 * 4 * bb * c * op               # y out-block (f32, double buffered)
                + 4 * bb * c * 4 * hp)              # xp (3Hp) + h (Hp) f32 VMEM scratch

    candidates = [c for c in range(1, T + 1)
                  if T % c == 0 and (c % 8 == 0 or c == T)]
    best = None
    for c in candidates:                            # ascending -> keep largest that fits
        if c <= 32 and footprint(c) <= budget:
            best = c
    if best is None:
        best = min(candidates)                      # smallest legal chunk (pathological H)
    return best


def _pack_gates(w_t, h, hp):
    """(K, 3H) -> (K, 3Hp): each gate segment (r|z|n) placed at lane offset g*Hp."""
    k = w_t.shape[0]
    out = jnp.zeros((k, 3 * hp), w_t.dtype)
    for g in range(3):
        out = out.at[:, g * hp:g * hp + h].set(w_t[:, g * h:(g + 1) * h])
    return out


# ---------------------------------------------------------------------------
# Fused kernel: per-chunk input projection -> serial GRU steps -> per-chunk Linear.
# ---------------------------------------------------------------------------
def _gru_fused_kernel(x_ref, wih_ref, whh_ref, bin_ref, bhn_ref, lw_ref, lb_ref,
                      y_ref, hlast_ref, xp_buf, h_buf):
    # x_ref:     (Bb, tc, I)        input chunk, batch-major (matches x layout in HBM)
    # wih_ref:   (I, 3Hp)           resident, gate lanes r|z|n each padded to Hp
    # whh_ref:   (Hp, 3Hp)          resident recurrent weights
    # bin_ref:   (1, 3Hp)  f32      b_ih (+ b_hh for r/z) folded, gate-lane padded
    # bhn_ref:   (1, Hp)   f32      b_hh of the n gate (must stay inside r*(...))
    # lw_ref:    (Hp, Op)           resident output Linear weight (lane-padded)
    # lb_ref:    (1, Op)   f32      output Linear bias
    # y_ref:     (Bb, tc, Op) f32   output chunk, batch-major
    # hlast_ref: (Bb, Hp)  f32      VMEM-resident hidden-state carry / final hidden state
    # xp_buf:    (Bb, tc, 3Hp) f32  scratch: per-chunk input projection
    # h_buf:     (Bb, tc, Hp)  f32  scratch: per-step hidden states within the chunk
    t_chunk = pl.program_id(1)

    @pl.when(t_chunk == 0)
    def _():
        hlast_ref[...] = jnp.zeros_like(hlast_ref)

    cdt = whh_ref.dtype
    bb, tc, _ = x_ref.shape
    hp = whh_ref.shape[0]

    # --- per-chunk input projection (off the per-timestep serial path) ---
    xp = jnp.einsum('bti,ig->btg', x_ref[...].astype(cdt), wih_ref[...],
                    preferred_element_type=jnp.float32)
    xp_buf[...] = xp + bin_ref[...]                       # (Bb, tc, 3Hp) f32 in VMEM

    whh = whh_ref[...]                                    # hoisted: one load per chunk
    b_hn = jnp.broadcast_to(bhn_ref[...], (bb, hp))       # hoisted broadcast

    def step(i, h):
        xp_t = xp_buf[:, i, :]                            # (Bb, 3Hp) f32
        hh = jnp.dot(h.astype(cdt), whh,
                     preferred_element_type=jnp.float32)  # single fused MXU matmul per step
        r = jax.nn.sigmoid(xp_t[:, :hp] + hh[:, :hp])
        z = jax.nn.sigmoid(xp_t[:, hp:2 * hp] + hh[:, hp:2 * hp])
        n = jnp.tanh(xp_t[:, 2 * hp:] + r * (hh[:, 2 * hp:] + b_hn))
        h_new = (1.0 - z) * n + z * h
        h_buf[:, i, :] = h_new
        return h_new

    h_final = jax.lax.fori_loop(0, tc, step, hlast_ref[...], unroll=(tc <= 16))
    hlast_ref[...] = h_final

    # --- per-chunk output Linear epilogue (also off the serial path) ---
    y = jnp.einsum('bth,ho->bto', h_buf[...].astype(cdt), lw_ref[...],
                   preferred_element_type=jnp.float32)
    y_ref[...] = (y + lb_ref[...]).astype(y_ref.dtype)


def gru_rnn_forward(x, params, compute_dtype=jnp.float32):
    """x: (B, T, I) f32.  params: PyTorch-shaped GRU + Linear weights.

    Returns (y: (B, T, O) f32, h_last: (1, B, H) f32), matching
    nn.GRU(batch_first=True) followed by nn.Linear(hidden, output).
    """
    weight_ih, weight_hh, bias_ih, bias_hh, lin_w, lin_b = params
    B, T, I = x.shape
    H = weight_hh.shape[1]
    O = lin_w.shape[0]
    hp = _round_up(H, 128)   # lane-aligned hidden width; padded lanes stay exactly zero
    op = _round_up(O, 128)   # lane-dense output stores (unmasked vst); sliced off below

    # ---- pad + pack weights (gate order r, z, n; each gate segment lane-aligned) ----
    wih_p = _pack_gates(jnp.asarray(weight_ih, jnp.float32).T, H, hp).astype(compute_dtype)
    whh_rows = jnp.zeros((hp, 3 * H), jnp.float32).at[:H].set(jnp.asarray(weight_hh, jnp.float32).T)
    whh_p = _pack_gates(whh_rows, H, hp).astype(compute_dtype)
    b_in = bias_ih + jnp.concatenate([bias_hh[:2 * H], jnp.zeros((H,), jnp.float32)])
    bin_p = _pack_gates(jnp.asarray(b_in, jnp.float32)[None], H, hp)           # (1, 3Hp) f32
    bhn_p = jnp.zeros((1, hp), jnp.float32).at[0, :H].set(bias_hh[2 * H:])     # (1, Hp)  f32
    lw_p = jnp.zeros((hp, op), jnp.float32).at[:H, :O].set(
        jnp.asarray(lin_w, jnp.float32).T).astype(compute_dtype)               # (Hp, Op)
    lb_p = jnp.zeros((1, op), jnp.float32).at[0, :O].set(lin_b)                # (1, Op)  f32

    nb = _pick_batch_blocks(B)
    bb = B // nb
    vlim = _vmem_limit_bytes()
    tc = _pick_time_chunk(T, bb, I, hp, op,
                          jnp.dtype(compute_dtype).itemsize, int(0.8 * vlim))

    y_pad, h_last = pl.pallas_call(
        _gru_fused_kernel,
        out_shape=(
            jax.ShapeDtypeStruct((B, T, op), jnp.float32),
            jax.ShapeDtypeStruct((B, hp), jnp.float32),
        ),
        grid_spec=pltpu.PrefetchScalarGridSpec(
            num_scalar_prefetch=0,
            grid=(nb, T // tc),
            in_specs=[
                pl.BlockSpec((bb, tc, I), lambda b, t: (b, t, 0)),   # x chunk (batch-major)
                pl.BlockSpec((I, 3 * hp), lambda b, t: (0, 0)),      # resident W_ih^T
                pl.BlockSpec((hp, 3 * hp), lambda b, t: (0, 0)),     # resident W_hh^T
                pl.BlockSpec((1, 3 * hp), lambda b, t: (0, 0)),      # resident folded bias
                pl.BlockSpec((1, hp), lambda b, t: (0, 0)),          # resident b_hn
                pl.BlockSpec((hp, op), lambda b, t: (0, 0)),         # resident Linear W^T
                pl.BlockSpec((1, op), lambda b, t: (0, 0)),          # resident Linear bias
            ],
            out_specs=[
                pl.BlockSpec((bb, tc, op), lambda b, t: (b, t, 0)),  # y chunk (batch-major)
                pl.BlockSpec((bb, hp), lambda b, t: (b, 0)),         # resident h carry
            ],
            scratch_shapes=[
                pltpu.VMEM((bb, tc, 3 * hp), jnp.float32),           # xp chunk
                pltpu.VMEM((bb, tc, hp), jnp.float32),               # h chunk
            ],
        ),
        compiler_params=pltpu.CompilerParams(
            dimension_semantics=("parallel", "arbitrary"),
            vmem_limit_bytes=vlim),
    )(x, wih_p, whh_p, bin_p, bhn_p, lw_p, lb_p)

    y = y_pad[:, :, :O]                 # drop lane padding of the Linear output
    h_last = h_last[:, :H][None]        # (1, B, H) like nn.GRU's h_n
    return y, h_last


# ---------------------------------------------------------------------------
# Parameters (PyTorch-shaped) and a pure-JAX reference with PyTorch semantics.
# ---------------------------------------------------------------------------
def make_params(key, input_size, hidden_size, output_size):
    ks = jax.random.split(key, 6)
    bound = 1.0 / jnp.sqrt(hidden_size)
    u = lambda k, shape: jax.random.uniform(k, shape, jnp.float32, -bound, bound)
    weight_ih = u(ks[0], (3 * hidden_size, input_size))    # nn.GRU weight_ih_l0
    weight_hh = u(ks[1], (3 * hidden_size, hidden_size))   # nn.GRU weight_hh_l0
    bias_ih = u(ks[2], (3 * hidden_size,))
    bias_hh = u(ks[3], (3 * hidden_size,))
    lin_w = u(ks[4], (output_size, hidden_size))           # nn.Linear weight
    lin_b = u(ks[5], (output_size,))                       # nn.Linear bias
    return weight_ih, weight_hh, bias_ih, bias_hh, lin_w, lin_b


def gru_rnn_reference(x, params):
    weight_ih, weight_hh, bias_ih, bias_hh, lin_w, lin_b = params
    B, T, I = x.shape
    H = weight_hh.shape[1]
    Wir, Wiz, Win = weight_ih[:H], weight_ih[H:2 * H], weight_ih[2 * H:]
    Whr, Whz, Whn = weight_hh[:H], weight_hh[H:2 * H], weight_hh[2 * H:]
    bir, biz, bin_ = bias_ih[:H], bias_ih[H:2 * H], bias_ih[2 * H:]
    bhr, bhz, bhn = bias_hh[:H], bias_hh[H:2 * H], bias_hh[2 * H:]

    def step(h, x_t):
        r = jax.nn.sigmoid(x_t @ Wir.T + bir + h @ Whr.T + bhr)
        z = jax.nn.sigmoid(x_t @ Wiz.T + biz + h @ Whz.T + bhz)
        n = jnp.tanh(x_t @ Win.T + bin_ + r * (h @ Whn.T + bhn))
        h_new = (1.0 - z) * n + z * h
        return h_new, h_new

    h0 = jnp.zeros((B, H), jnp.float32)
    h_last, h_seq = jax.lax.scan(step, h0, jnp.transpose(x, (1, 0, 2)))
    y = jnp.transpose(h_seq, (1, 0, 2)) @ lin_w.T + lin_b
    return y, h_last[None]


if __name__ == "__main__":
    B, T, I, H, O = 2, 8, 4, 32, 8

    key = jax.random.PRNGKey(0)
    kx, kp = jax.random.split(key)
    x = jax.random.normal(kx, (B, T, I), jnp.float32)
    params = make_params(kp, I, H, O)

    y_ref, h_ref = gru_rnn_reference(x, params)

    # f32 path: strict correctness check against the PyTorch-semantics reference.
    fwd_f32 = jax.jit(functools.partial(gru_rnn_forward, compute_dtype=jnp.float32))
    y, h_last = fwd_f32(x, params)
    jax.block_until_ready((y, h_last))
    assert y.shape == (B, T, O) and h_last.shape == (1, B, H)
    assert jnp.allclose(y, y_ref, atol=1e-5, rtol=1e-5)
    assert jnp.allclose(h_last, h_ref, atol=1e-5, rtol=1e-5)

    # bf16-weight path (MXU-friendly); f32 accumulation + f32 hidden carry keep drift small.
    fwd_bf16 = jax.jit(functools.partial(gru_rnn_forward, compute_dtype=jnp.bfloat16))
    y16, h16 = fwd_bf16(x, params)
    jax.block_until_ready((y16, h16))
    assert jnp.allclose(y16, y_ref, atol=1e-1, rtol=1e-1)
    assert jnp.allclose(h16, h_ref, atol=1e-1, rtol=1e-1)

    print("KERNEL_OK")
</pallas_src>

<mosaic_0001>
module attributes {stable_mosaic.version = 11 : i64} {
  func.func @_gru_fused_kernel(%arg0: i32, %arg1: i32, %arg2: memref<2x8x4xf32, #tpu.memory_space<vmem>>, %arg3: memref<4x384xf32, #tpu.memory_space<vmem>>, %arg4: memref<128x384xf32, #tpu.memory_space<vmem>>, %arg5: memref<1x384xf32, #tpu.memory_space<vmem>>, %arg6: memref<1x128xf32, #tpu.memory_space<vmem>>, %arg7: memref<128x128xf32, #tpu.memory_space<vmem>>, %arg8: memref<1x128xf32, #tpu.memory_space<vmem>>, %arg9: memref<2x8x128xf32, #tpu.memory_space<vmem>>, %arg10: memref<2x128xf32, #tpu.memory_space<vmem>>, %arg11: memref<2x8x384xf32, #tpu.memory_space<vmem>>, %arg12: memref<2x8x128xf32, #tpu.memory_space<vmem>>) attributes {dimension_semantics = [#tpu.dimension_semantics<parallel>, #tpu.dimension_semantics<arbitrary>], iteration_bounds = array<i64: 1, 1>, scalar_prefetch = 0 : i64, scratch_operands = 2 : i64, tpu.core_type = #tpu.core_type<tc>, window_params = [{transform_indices = @transform_0, window_bounds = array<i64: 2, 8, 4>}, {pipeline_mode = #tpu.pipeline_mode<synchronous>, transform_indices = @transform_1, window_bounds = array<i64: 4, 384>}, {pipeline_mode = #tpu.pipeline_mode<synchronous>, transform_indices = @transform_2, window_bounds = array<i64: 128, 384>}, {pipeline_mode = #tpu.pipeline_mode<synchronous>, transform_indices = @transform_3, window_bounds = array<i64: 1, 384>}, {pipeline_mode = #tpu.pipeline_mode<synchronous>, transform_indices = @transform_4, window_bounds = array<i64: 1, 128>}, {pipeline_mode = #tpu.pipeline_mode<synchronous>, transform_indices = @transform_5, window_bounds = array<i64: 128, 128>}, {pipeline_mode = #tpu.pipeline_mode<synchronous>, transform_indices = @transform_6, window_bounds = array<i64: 1, 128>}, {transform_indices = @transform_7, window_bounds = array<i64: 2, 8, 128>}, {transform_indices = @transform_8, window_bounds = array<i64: 2, 128>}]} {
    %c0_i32 = arith.constant 0 : i32
    %0 = arith.cmpi eq, %arg1, %c0_i32 : i32
    %1 = arith.extui %0 : i1 to i32
    %c0_i32_0 = arith.constant 0 : i32
    %2 = arith.cmpi ne, %1, %c0_i32_0 : i32
    scf.if %2 {
      %cst_94 = arith.constant 0.000000e+00 : f32
      %305 = vector.broadcast %cst_94 : f32 to vector<2x128xf32>
      %c0_95 = arith.constant 0 : index
      %c0_96 = arith.constant 0 : index
      %306 = vector.load %arg10[%c0_95, %c0_96] : memref<2x128xf32, #tpu.memory_space<vmem>>, vector<2x128xf32>
      tpu.vector_store %arg10[%c0_95, %c0_96], %305 {strides = array<i32>} : memref<2x128xf32, #tpu.memory_space<vmem>>, vector<2x128xf32>,
    } else {
    }
    %c0 = arith.constant 0 : index
    %c0_1 = arith.constant 0 : index
    %c0_2 = arith.constant 0 : index
    %3 = vector.load %arg2[%c0, %c0_1, %c0_2] : memref<2x8x4xf32, #tpu.memory_space<vmem>>, vector<2x8x4xf32>
    %c0_3 = arith.constant 0 : index
    %c0_4 = arith.constant 0 : index
    %4 = vector.load %arg3[%c0_3, %c0_4] : memref<4x384xf32, #tpu.memory_space<vmem>>, vector<4x384xf32>
    "tpu.trace_start"() <{level = 10 : i32, message = "bti,ig->btg"}> : () -> ()
    %cst = arith.constant dense<0.000000e+00> : vector<2x8x384xf32>
    %5 = tpu.matmul %3, %4, %cst {dimension_numbers = #tpu.dot_dimension_numbers<[2], [0], [0, 1], [1], [0, 0, 0, 1, 1, 1], [], []>} : vector<2x8x4xf32>, vector<4x384xf32>, vector<2x8x384xf32> -> vector<2x8x384xf32>
    "tpu.trace_stop"() : () -> ()
    %c0_5 = arith.constant 0 : index
    %c0_6 = arith.constant 0 : index
    %6 = vector.load %arg5[%c0_5, %c0_6] : memref<1x384xf32, #tpu.memory_space<vmem>>, vector<1x384xf32>
    %7 = vector.shape_cast %6 : vector<1x384xf32> to vector<1x1x384xf32>
    %8 = vector.broadcast %7 : vector<1x1x384xf32> to vector<2x8x384xf32>
    %9 = arith.addf %5, %8 : vector<2x8x384xf32>
    %c0_7 = arith.constant 0 : index
    %c0_8 = arith.constant 0 : index
    %c0_9 = arith.constant 0 : index
    %10 = vector.load %arg11[%c0_7, %c0_8, %c0_9] : memref<2x8x384xf32, #tpu.memory_space<vmem>>, vector<2x8x384xf32>
    tpu.vector_store %arg11[%c0_7, %c0_8, %c0_9], %9 {strides = array<i32>} : memref<2x8x384xf32, #tpu.memory_space<vmem>>, vector<2x8x384xf32>,
    %c0_10 = arith.constant 0 : index
    %c0_11 = arith.constant 0 : index
    %11 = vector.load %arg4[%c0_10, %c0_11] : memref<128x384xf32, #tpu.memory_space<vmem>>, vector<128x384xf32>
    %c0_12 = arith.constant 0 : index
    %c0_13 = arith.constant 0 : index
    %12 = vector.load %arg6[%c0_12, %c0_13] : memref<1x128xf32, #tpu.memory_space<vmem>>, vector<1x128xf32>
    %13 = vector.shape_cast %12 : vector<1x128xf32> to vector<1x128xf32>
    %14 = vector.broadcast %13 : vector<1x128xf32> to vector<2x128xf32>
    %c0_14 = arith.constant 0 : index
    %c0_15 = arith.constant 0 : index
    %15 = vector.load %arg10[%c0_14, %c0_15] : memref<2x128xf32, #tpu.memory_space<vmem>>, vector<2x128xf32>
    %c0_i32_16 = arith.constant 0 : i32
    %c0_17 = arith.constant 0 : index
    %16 = arith.index_cast %c0_i32_16 : i32 to index
    %c0_18 = arith.constant 0 : index
    %17 = vector.load %arg11[%c0_17, %16, %c0_18] : memref<2x8x384xf32, #tpu.memory_space<vmem>>, vector<2x1x384xf32>
    %18 = vector.shape_cast %17 : vector<2x1x384xf32> to vector<2x384xf32>
    %cst_19 = arith.constant dense<0.000000e+00> : vector<2x384xf32>
    %19 = tpu.matmul %15, %11, %cst_19 {dimension_numbers = #tpu.dot_dimension_numbers<[1], [0], [0], [1], [0, 0, 1, 1], [], []>} : vector<2x128xf32>, vector<128x384xf32>, vector<2x384xf32> -> vector<2x384xf32>
    %20 = vector.extract_strided_slice %18 {offsets = [0, 0], sizes = [2, 128], strides = [1, 1]} : vector<2x384xf32> to vector<2x128xf32>
    %21 = vector.extract_strided_slice %19 {offsets = [0, 0], sizes = [2, 128], strides = [1, 1]} : vector<2x384xf32> to vector<2x128xf32>
    %22 = arith.addf %20, %21 : vector<2x128xf32>
    %23 = arith.negf %22 : vector<2x128xf32>
    %24 = math.exp %23 : vector<2x128xf32>
    %cst_20 = arith.constant 1.000000e+00 : f32
    %25 = vector.broadcast %cst_20 : f32 to vector<2x128xf32>
    %26 = arith.addf %25, %24 : vector<2x128xf32>
    %27 = arith.divf %25, %26 : vector<2x128xf32>
    %28 = vector.extract_strided_slice %18 {offsets = [0, 128], sizes = [2, 128], strides = [1, 1]} : vector<2x384xf32> to vector<2x128xf32>
    %29 = vector.extract_strided_slice %19 {offsets = [0, 128], sizes = [2, 128], strides = [1, 1]} : vector<2x384xf32> to vector<2x128xf32>
    %30 = arith.addf %28, %29 : vector<2x128xf32>
    %31 = arith.negf %30 : vector<2x128xf32>
    %32 = math.exp %31 : vector<2x128xf32>
    %cst_21 = arith.constant 1.000000e+00 : f32
    %33 = vector.broadcast %cst_21 : f32 to vector<2x128xf32>
    %34 = arith.addf %33, %32 : vector<2x128xf32>
    %35 = arith.divf %33, %34 : vector<2x128xf32>
    %36 = vector.extract_strided_slice %18 {offsets = [0, 256], sizes = [2, 128], strides = [1, 1]} : vector<2x384xf32> to vector<2x128xf32>
    %37 = vector.extract_strided_slice %19 {offsets = [0, 256], sizes = [2, 128], strides = [1, 1]} : vector<2x384xf32> to vector<2x128xf32>
    %38 = arith.addf %37, %14 : vector<2x128xf32>
    %39 = arith.mulf %27, %38 : vector<2x128xf32>
    %40 = arith.addf %36, %39 : vector<2x128xf32>
    %41 = math.tanh %40 : vector<2x128xf32>
    %cst_22 = arith.constant 1.000000e+00 : f32
    %42 = vector.broadcast %cst_22 : f32 to vector<2x128xf32>
    %43 = arith.subf %42, %35 : vector<2x128xf32>
    %44 = arith.mulf %43, %41 : vector<2x128xf32>
    %45 = arith.mulf %35, %15 : vector<2x128xf32>
    %46 = arith.addf %44, %45 : vector<2x128xf32>
    %c0_23 = arith.constant 0 : index
    %47 = arith.index_cast %c0_i32_16 : i32 to index
    %c0_24 = arith.constant 0 : index
    %48 = vector.load %arg12[%c0_23, %47, %c0_24] : memref<2x8x128xf32, #tpu.memory_space<vmem>>, vector<2x1x128xf32>
    %49 = vector.shape_cast %48 : vector<2x1x128xf32> to vector<2x128xf32>
    %50 = vector.shape_cast %46 : vector<2x128xf32> to vector<2x1x128xf32>
    tpu.vector_store %arg12[%c0_23, %47, %c0_24], %50 {strides = array<i32>} : memref<2x8x128xf32, #tpu.memory_space<vmem>>, vector<2x1x128xf32>,
    %c1_i32 = arith.constant 1 : i32
    %c0_25 = arith.constant 0 : index
    %51 = arith.index_cast %c1_i32 : i32 to index
    %c0_26 = arith.constant 0 : index
    %52 = vector.load %arg11[%c0_25, %51, %c0_26] : memref<2x8x384xf32, #tpu.memory_space<vmem>>, vector<2x1x384xf32>
    %53 = vector.shape_cast %52 : vector<2x1x384xf32> to vector<2x384xf32>
    %cst_27 = arith.constant dense<0.000000e+00> : vector<2x384xf32>
    %54 = tpu.matmul %46, %11, %cst_27 {dimension_numbers = #tpu.dot_dimension_numbers<[1], [0], [0], [1], [0, 0, 1, 1], [], []>} : vector<2x128xf32>, vector<128x384xf32>, vector<2x384xf32> -> vector<2x384xf32>
    %55 = vector.extract_strided_slice %53 {offsets = [0, 0], sizes = [2, 128], strides = [1, 1]} : vector<2x384xf32> to vector<2x128xf32>
    %56 = vector.extract_strided_slice %54 {offsets = [0, 0], sizes = [2, 128], strides = [1, 1]} : vector<2x384xf32> to vector<2x128xf32>
    %57 = arith.addf %55, %56 : vector<2x128xf32>
    %58 = arith.negf %57 : vector<2x128xf32>
    %59 = math.exp %58 : vector<2x128xf32>
    %cst_28 = arith.constant 1.000000e+00 : f32
    %60 = vector.broadcast %cst_28 : f32 to vector<2x128xf32>
    %61 = arith.addf %60, %59 : vector<2x128xf32>
    %62 = arith.divf %60, %61 : vector<2x128xf32>
    %63 = vector.extract_strided_slice %53 {offsets = [0, 128], sizes = [2, 128], strides = [1, 1]} : vector<2x384xf32> to vector<2x128xf32>
    %64 = vector.extract_strided_slice %54 {offsets = [0, 128], sizes = [2, 128], strides = [1, 1]} : vector<2x384xf32> to vector<2x128xf32>
    %65 = arith.addf %63, %64 : vector<2x128xf32>
    %66 = arith.negf %65 : vector<2x128xf32>
    %67 = math.exp %66 : vector<2x128xf32>
    %cst_29 = arith.constant 1.000000e+00 : f32
    %68 = vector.broadcast %cst_29 : f32 to vector<2x128xf32>
    %69 = arith.addf %68, %67 : vector<2x128xf32>
    %70 = arith.divf %68, %69 : vector<2x128xf32>
    %71 = vector.extract_strided_slice %53 {offsets = [0, 256], sizes = [2, 128], strides = [1, 1]} : vector<2x384xf32> to vector<2x128xf32>
    %72 = vector.extract_strided_slice %54 {offsets = [0, 256], sizes = [2, 128], strides = [1, 1]} : vector<2x384xf32> to vector<2x128xf32>
    %73 = arith.addf %72, %14 : vector<2x128xf32>
    %74 = arith.mulf %62, %73 : vector<2x128xf32>
    %75 = arith.addf %71, %74 : vector<2x128xf32>
    %76 = math.tanh %75 : vector<2x128xf32>
    %cst_30 = arith.constant 1.000000e+00 : f32
    %77 = vector.broadcast %cst_30 : f32 to vector<2x128xf32>
    %78 = arith.subf %77, %70 : vector<2x128xf32>
    %79 = arith.mulf %78, %76 : vector<2x128xf32>
    %80 = arith.mulf %70, %46 : vector<2x128xf32>
    %81 = arith.addf %79, %80 : vector<2x128xf32>
    %c0_31 = arith.constant 0 : index
    %82 = arith.index_cast %c1_i32 : i32 to index
    %c0_32 = arith.constant 0 : index
    %83 = vector.load %arg12[%c0_31, %82, %c0_32] : memref<2x8x128xf32, #tpu.memory_space<vmem>>, vector<2x1x128xf32>
    %84 = vector.shape_cast %83 : vector<2x1x128xf32> to vector<2x128xf32>
    %85 = vector.shape_cast %81 : vector<2x128xf32> to vector<2x1x128xf32>
    tpu.vector_store %arg12[%c0_31, %82, %c0_32], %85 {strides = array<i32>} : memref<2x8x128xf32, #tpu.memory_space<vmem>>, vector<2x1x128xf32>,
    %c2_i32 = arith.constant 2 : i32
    %c0_33 = arith.constant 0 : index
    %86 = arith.index_cast %c2_i32 : i32 to index
    %c0_34 = arith.constant 0 : index
    %87 = vector.load %arg11[%c0_33, %86, %c0_34] : memref<2x8x384xf32, #tpu.memory_space<vmem>>, vector<2x1x384xf32>
    %88 = vector.shape_cast %87 : vector<2x1x384xf32> to vector<2x384xf32>
    %cst_35 = arith.constant dense<0.000000e+00> : vector<2x384xf32>
    %89 = tpu.matmul %81, %11, %cst_35 {dimension_numbers = #tpu.dot_dimension_numbers<[1], [0], [0], [1], [0, 0, 1, 1], [], []>} : vector<2x128xf32>, vector<128x384xf32>, vector<2x384xf32> -> vector<2x384xf32>
    %90 = vector.extract_strided_slice %88 {offsets = [0, 0], sizes = [2, 128], strides = [1, 1]} : vector<2x384xf32> to vector<2x128xf32>
    %91 = vector.extract_strided_slice %89 {offsets = [0, 0], sizes = [2, 128], strides = [1, 1]} : vector<2x384xf32> to vector<2x128xf32>
    %92 = arith.addf %90, %91 : vector<2x128xf32>
    %93 = arith.negf %92 : vector<2x128xf32>
    %94 = math.exp %93 : vector<2x128xf32>
    %cst_36 = arith.constant 1.000000e+00 : f32
    %95 = vector.broadcast %cst_36 : f32 to vector<2x128xf32>
    %96 = arith.addf %95, %94 : vector<2x128xf32>
    %97 = arith.divf %95, %96 : vector<2x128xf32>
    %98 = vector.extract_strided_slice %88 {offsets = [0, 128], sizes = [2, 128], strides = [1, 1]} : vector<2x384xf32> to vector<2x128xf32>
    %99 = vector.extract_strided_slice %89 {offsets = [0, 128], sizes = [2, 128], strides = [1, 1]} : vector<2x384xf32> to vector<2x128xf32>
    %100 = arith.addf %98, %99 : vector<2x128xf32>
    %101 = arith.negf %100 : vector<2x128xf32>
    %102 = math.exp %101 : vector<2x128xf32>
    %cst_37 = arith.constant 1.000000e+00 : f32
    %103 = vector.broadcast %cst_37 : f32 to vector<2x128xf32>
    %104 = arith.addf %103, %102 : vector<2x128xf32>
    %105 = arith.divf %103, %104 : vector<2x128xf32>
    %106 = vector.extract_strided_slice %88 {offsets = [0, 256], sizes = [2, 128], strides = [1, 1]} : vector<2x384xf32> to vector<2x128xf32>
    %107 = vector.extract_strided_slice %89 {offsets = [0, 256], sizes = [2, 128], strides = [1, 1]} : vector<2x384xf32> to vector<2x128xf32>
    %108 = arith.addf %107, %14 : vector<2x128xf32>
    %109 = arith.mulf %97, %108 : vector<2x128xf32>
    %110 = arith.addf %106, %109 : vector<2x128xf32>
    %111 = math.tanh %110 : vector<2x128xf32>
    %cst_38 = arith.constant 1.000000e+00 : f32
    %112 = vector.broadcast %cst_38 : f32 to vector<2x128xf32>
    %113 = arith.subf %112, %105 : vector<2x128xf32>
    %114 = arith.mulf %113, %111 : vector<2x128xf32>
    %115 = arith.mulf %105, %81 : vector<2x128xf32>
    %116 = arith.addf %114, %115 : vector<2x128xf32>
    %c0_39 = arith.constant 0 : index
    %117 = arith.index_cast %c2_i32 : i32 to index
    %c0_40 = arith.constant 0 : index
    %118 = vector.load %arg12[%c0_39, %117, %c0_40] : memref<2x8x128xf32, #tpu.memory_space<vmem>>, vector<2x1x128xf32>
    %119 = vector.shape_cast %118 : vector<2x1x128xf32> to vector<2x128xf32>
    %120 = vector.shape_cast %116 : vector<2x128xf32> to vector<2x1x128xf32>
    tpu.vector_store %arg12[%c0_39, %117, %c0_40], %120 {strides = array<i32>} : memref<2x8x128xf32, #tpu.memory_space<vmem>>, vector<2x1x128xf32>,
    %c3_i32 = arith.constant 3 : i32
    %c0_41 = arith.constant 0 : index
    %121 = arith.index_cast %c3_i32 : i32 to index
    %c0_42 = arith.constant 0 : index
    %122 = vector.load %arg11[%c0_41, %121, %c0_42] : memref<2x8x384xf32, #tpu.memory_space<vmem>>, vector<2x1x384xf32>
    %123 = vector.shape_cast %122 : vector<2x1x384xf32> to vector<2x384xf32>
    %cst_43 = arith.constant dense<0.000000e+00> : vector<2x384xf32>
    %124 = tpu.matmul %116, %11, %cst_43 {dimension_numbers = #tpu.dot_dimension_numbers<[1], [0], [0], [1], [0, 0, 1, 1], [], []>} : vector<2x128xf32>, vector<128x384xf32>, vector<2x384xf32> -> vector<2x384xf32>
    %125 = vector.extract_strided_slice %123 {offsets = [0, 0], sizes = [2, 128], strides = [1, 1]} : vector<2x384xf32> to vector<2x128xf32>
    %126 = vector.extract_strided_slice %124 {offsets = [0, 0], sizes = [2, 128], strides = [1, 1]} : vector<2x384xf32> to vector<2x128xf32>
    %127 = arith.addf %125, %126 : vector<2x128xf32>
    %128 = arith.negf %127 : vector<2x128xf32>
    %129 = math.exp %128 : vector<2x128xf32>
    %cst_44 = arith.constant 1.000000e+00 : f32
    %130 = vector.broadcast %cst_44 : f32 to vector<2x128xf32>
    %131 = arith.addf %130, %129 : vector<2x128xf32>
    %132 = arith.divf %130, %131 : vector<2x128xf32>
    %133 = vector.extract_strided_slice %123 {offsets = [0, 128], sizes = [2, 128], strides = [1, 1]} : vector<2x384xf32> to vector<2x128xf32>
    %134 = vector.extract_strided_slice %124 {offsets = [0, 128], sizes = [2, 128], strides = [1, 1]} : vector<2x384xf32> to vector<2x128xf32>
    %135 = arith.addf %133, %134 : vector<2x128xf32>
    %136 = arith.negf %135 : vector<2x128xf32>
    %137 = math.exp %136 : vector<2x128xf32>
    %cst_45 = arith.constant 1.000000e+00 : f32
    %138 = vector.broadcast %cst_45 : f32 to vector<2x128xf32>
    %139 = arith.addf %138, %137 : vector<2x128xf32>
    %140 = arith.divf %138, %139 : vector<2x128xf32>
    %141 = vector.extract_strided_slice %123 {offsets = [0, 256], sizes = [2, 128], strides = [1, 1]} : vector<2x384xf32> to vector<2x128xf32>
    %142 = vector.extract_strided_slice %124 {offsets = [0, 256], sizes = [2, 128], strides = [1, 1]} : vector<2x384xf32> to vector<2x128xf32>
    %143 = arith.addf %142, %14 : vector<2x128xf32>
    %144 = arith.mulf %132, %143 : vector<2x128xf32>
    %145 = arith.addf %141, %144 : vector<2x128xf32>
    %146 = math.tanh %145 : vector<2x128xf32>
    %cst_46 = arith.constant 1.000000e+00 : f32
    %147 = vector.broadcast %cst_46 : f32 to vector<2x128xf32>
    %148 = arith.subf %147, %140 : vector<2x128xf32>
    %149 = arith.mulf %148, %146 : vector<2x128xf32>
    %150 = arith.mulf %140, %116 : vector<2x128xf32>
    %151 = arith.addf %149, %150 : vector<2x128xf32>
    %c0_47 = arith.constant 0 : index
    %152 = arith.index_cast %c3_i32 : i32 to index
    %c0_48 = arith.constant 0 : index
    %153 = vector.load %arg12[%c0_47, %152, %c0_48] : memref<2x8x128xf32, #tpu.memory_space<vmem>>, vector<2x1x128xf32>
    %154 = vector.shape_cast %153 : vector<2x1x128xf32> to vector<2x128xf32>
    %155 = vector.shape_cast %151 : vector<2x128xf32> to vector<2x1x128xf32>
    tpu.vector_store %arg12[%c0_47, %152, %c0_48], %155 {strides = array<i32>} : memref<2x8x128xf32, #tpu.memory_space<vmem>>, vector<2x1x128xf32>,
    %c4_i32 = arith.constant 4 : i32
    %c0_49 = arith.constant 0 : index
    %156 = arith.index_cast %c4_i32 : i32 to index
    %c0_50 = arith.constant 0 : index
    %157 = vector.load %arg11[%c0_49, %156, %c0_50] : memref<2x8x384xf32, #tpu.memory_space<vmem>>, vector<2x1x384xf32>
    %158 = vector.shape_cast %157 : vector<2x1x384xf32> to vector<2x384xf32>
    %cst_51 = arith.constant dense<0.000000e+00> : vector<2x384xf32>
    %159 = tpu.matmul %151, %11, %cst_51 {dimension_numbers = #tpu.dot_dimension_numbers<[1], [0], [0], [1], [0, 0, 1, 1], [], []>} : vector<2x128xf32>, vector<128x384xf32>, vector<2x384xf32> -> vector<2x384xf32>
    %160 = vector.extract_strided_slice %158 {offsets = [0, 0], sizes = [2, 128], strides = [1, 1]} : vector<2x384xf32> to vector<2x128xf32>
    %161 = vector.extract_strided_slice %159 {offsets = [0, 0], sizes = [2, 128], strides = [1, 1]} : vector<2x384xf32> to vector<2x128xf32>
    %162 = arith.addf %160, %161 : vector<2x128xf32>
    %163 = arith.negf %162 : vector<2x128xf32>
    %164 = math.exp %163 : vector<2x128xf32>
    %cst_52 = arith.constant 1.000000e+00 : f32
    %165 = vector.broadcast %cst_52 : f32 to vector<2x128xf32>
    %166 = arith.addf %165, %164 : vector<2x128xf32>
    %167 = arith.divf %165, %166 : vector<2x128xf32>
    %168 = vector.extract_strided_slice %158 {offsets = [0, 128], sizes = [2, 128], strides = [1, 1]} : vector<2x384xf32> to vector<2x128xf32>
    %169 = vector.extract_strided_slice %159 {offsets = [0, 128], sizes = [2, 128], strides = [1, 1]} : vector<2x384xf32> to vector<2x128xf32>
    %170 = arith.addf %168, %169 : vector<2x128xf32>
    %171 = arith.negf %170 : vector<2x128xf32>
    %172 = math.exp %171 : vector<2x128xf32>
    %cst_53 = arith.constant 1.000000e+00 : f32
    %173 = vector.broadcast %cst_53 : f32 to vector<2x128xf32>
    %174 = arith.addf %173, %172 : vector<2x128xf32>
    %175 = arith.divf %173, %174 : vector<2x128xf32>
    %176 = vector.extract_strided_slice %158 {offsets = [0, 256], sizes = [2, 128], strides = [1, 1]} : vector<2x384xf32> to vector<2x128xf32>
    %177 = vector.extract_strided_slice %159 {offsets = [0, 256], sizes = [2, 128], strides = [1, 1]} : vector<2x384xf32> to vector<2x128xf32>
    %178 = arith.addf %177, %14 : vector<2x128xf32>
    %179 = arith.mulf %167, %178 : vector<2x128xf32>
    %180 = arith.addf %176, %179 : vector<2x128xf32>
    %181 = math.tanh %180 : vector<2x128xf32>
    %cst_54 = arith.constant 1.000000e+00 : f32
    %182 = vector.broadcast %cst_54 : f32 to vector<2x128xf32>
    %183 = arith.subf %182, %175 : vector<2x128xf32>
    %184 = arith.mulf %183, %181 : vector<2x128xf32>
    %185 = arith.mulf %175, %151 : vector<2x128xf32>
    %186 = arith.addf %184, %185 : vector<2x128xf32>
    %c0_55 = arith.constant 0 : index
    %187 = arith.index_cast %c4_i32 : i32 to index
    %c0_56 = arith.constant 0 : index
    %188 = vector.load %arg12[%c0_55, %187, %c0_56] : memref<2x8x128xf32, #tpu.memory_space<vmem>>, vector<2x1x128xf32>
    %189 = vector.shape_cast %188 : vector<2x1x128xf32> to vector<2x128xf32>
    %190 = vector.shape_cast %186 : vector<2x128xf32> to vector<2x1x128xf32>
    tpu.vector_store %arg12[%c0_55, %187, %c0_56], %190 {strides = array<i32>} : memref<2x8x128xf32, #tpu.memory_space<vmem>>, vector<2x1x128xf32>,
    %c5_i32 = arith.constant 5 : i32
    %c0_57 = arith.constant 0 : index
    %191 = arith.index_cast %c5_i32 : i32 to index
    %c0_58 = arith.constant 0 : index
    %192 = vector.load %arg11[%c0_57, %191, %c0_58] : memref<2x8x384xf32, #tpu.memory_space<vmem>>, vector<2x1x384xf32>
    %193 = vector.shape_cast %192 : vector<2x1x384xf32> to vector<2x384xf32>
    %cst_59 = arith.constant dense<0.000000e+00> : vector<2x384xf32>
    %194 = tpu.matmul %186, %11, %cst_59 {dimension_numbers = #tpu.dot_dimension_numbers<[1], [0], [0], [1], [0, 0, 1, 1], [], []>} : vector<2x128xf32>, vector<128x384xf32>, vector<2x384xf32> -> vector<2x384xf32>
    %195 = vector.extract_strided_slice %193 {offsets = [0, 0], sizes = [2, 128], strides = [1, 1]} : vector<2x384xf32> to vector<2x128xf32>
    %196 = vector.extract_strided_slice %194 {offsets = [0, 0], sizes = [2, 128], strides = [1, 1]} : vector<2x384xf32> to vector<2x128xf32>
    %197 = arith.addf %195, %196 : vector<2x128xf32>
    %198 = arith.negf %197 : vector<2x128xf32>
    %199 = math.exp %198 : vector<2x128xf32>
    %cst_60 = arith.constant 1.000000e+00 : f32
    %200 = vector.broadcast %cst_60 : f32 to vector<2x128xf32>
    %201 = arith.addf %200, %199 : vector<2x128xf32>
    %202 = arith.divf %200, %201 : vector<2x128xf32>
    %203 = vector.extract_strided_slice %193 {offsets = [0, 128], sizes = [2, 128], strides = [1, 1]} : vector<2x384xf32> to vector<2x128xf32>
    %204 = vector.extract_strided_slice %194 {offsets = [0, 128], sizes = [2, 128], strides = [1, 1]} : vector<2x384xf32> to vector<2x128xf32>
    %205 = arith.addf %203, %204 : vector<2x128xf32>
    %206 = arith.negf %205 : vector<2x128xf32>
    %207 = math.exp %206 : vector<2x128xf32>
    %cst_61 = arith.constant 1.000000e+00 : f32
    %208 = vector.broadcast %cst_61 : f32 to vector<2x128xf32>
    %209 = arith.addf %208, %207 : vector<2x128xf32>
    %210 = arith.divf %208, %209 : vector<2x128xf32>
    %211 = vector.extract_strided_slice %193 {offsets = [0, 256], sizes = [2, 128], strides = [1, 1]} : vector<2x384xf32> to vector<2x128xf32>
    %212 = vector.extract_strided_slice %194 {offsets = [0, 256], sizes = [2, 128], strides = [1, 1]} : vector<2x384xf32> to vector<2x128xf32>
    %213 = arith.addf %212, %14 : vector<2x128xf32>
    %214 = arith.mulf %202, %213 : vector<2x128xf32>
    %215 = arith.addf %211, %214 : vector<2x128xf32>
    %216 = math.tanh %215 : vector<2x128xf32>
    %cst_62 = arith.constant 1.000000e+00 : f32
    %217 = vector.broadcast %cst_62 : f32 to vector<2x128xf32>
    %218 = arith.subf %217, %210 : vector<2x128xf32>
    %219 = arith.mulf %218, %216 : vector<2x128xf32>
    %220 = arith.mulf %210, %186 : vector<2x128xf32>
    %221 = arith.addf %219, %220 : vector<2x128xf32>
    %c0_63 = arith.constant 0 : index
    %222 = arith.index_cast %c5_i32 : i32 to index
    %c0_64 = arith.constant 0 : index
    %223 = vector.load %arg12[%c0_63, %222, %c0_64] : memref<2x8x128xf32, #tpu.memory_space<vmem>>, vector<2x1x128xf32>
    %224 = vector.shape_cast %223 : vector<2x1x128xf32> to vector<2x128xf32>
    %225 = vector.shape_cast %221 : vector<2x128xf32> to vector<2x1x128xf32>
    tpu.vector_store %arg12[%c0_63, %222, %c0_64], %225 {strides = array<i32>} : memref<2x8x128xf32, #tpu.memory_space<vmem>>, vector<2x1x128xf32>,
    %c6_i32 = arith.constant 6 : i32
    %c0_65 = arith.constant 0 : index
    %226 = arith.index_cast %c6_i32 : i32 to index
    %c0_66 = arith.constant 0 : index
    %227 = vector.load %arg11[%c0_65, %226, %c0_66] : memref<2x8x384xf32, #tpu.memory_space<vmem>>, vector<2x1x384xf32>
    %228 = vector.shape_cast %227 : vector<2x1x384xf32> to vector<2x384xf32>
    %cst_67 = arith.constant dense<0.000000e+00> : vector<2x384xf32>
    %229 = tpu.matmul %221, %11, %cst_67 {dimension_numbers = #tpu.dot_dimension_numbers<[1], [0], [0], [1], [0, 0, 1, 1], [], []>} : vector<2x128xf32>, vector<128x384xf32>, vector<2x384xf32> -> vector<2x384xf32>
    %230 = vector.extract_strided_slice %228 {offsets = [0, 0], sizes = [2, 128], strides = [1, 1]} : vector<2x384xf32> to vector<2x128xf32>
    %231 = vector.extract_strided_slice %229 {offsets = [0, 0], sizes = [2, 128], strides = [1, 1]} : vector<2x384xf32> to vector<2x128xf32>
    %232 = arith.addf %230, %231 : vector<2x128xf32>
    %233 = arith.negf %232 : vector<2x128xf32>
    %234 = math.exp %233 : vector<2x128xf32>
    %cst_68 = arith.constant 1.000000e+00 : f32
    %235 = vector.broadcast %cst_68 : f32 to vector<2x128xf32>
    %236 = arith.addf %235, %234 : vector<2x128xf32>
    %237 = arith.divf %235, %236 : vector<2x128xf32>
    %238 = vector.extract_strided_slice %228 {offsets = [0, 128], sizes = [2, 128], strides = [1, 1]} : vector<2x384xf32> to vector<2x128xf32>
    %239 = vector.extract_strided_slice %229 {offsets = [0, 128], sizes = [2, 128], strides = [1, 1]} : vector<2x384xf32> to vector<2x128xf32>
    %240 = arith.addf %238, %239 : vector<2x128xf32>
    %241 = arith.negf %240 : vector<2x128xf32>
    %242 = math.exp %241 : vector<2x128xf32>
    %cst_69 = arith.constant 1.000000e+00 : f32
    %243 = vector.broadcast %cst_69 : f32 to vector<2x128xf32>
    %244 = arith.addf %243, %242 : vector<2x128xf32>
    %245 = arith.divf %243, %244 : vector<2x128xf32>
    %246 = vector.extract_strided_slice %228 {offsets = [0, 256], sizes = [2, 128], strides = [1, 1]} : vector<2x384xf32> to vector<2x128xf32>
    %247 = vector.extract_strided_slice %229 {offsets = [0, 256], sizes = [2, 128], strides = [1, 1]} : vector<2x384xf32> to vector<2x128xf32>
    %248 = arith.addf %247, %14 : vector<2x128xf32>
    %249 = arith.mulf %237, %248 : vector<2x128xf32>
    %250 = arith.addf %246, %249 : vector<2x128xf32>
    %251 = math.tanh %250 : vector<2x128xf32>
    %cst_70 = arith.constant 1.000000e+00 : f32
    %252 = vector.broadcast %cst_70 : f32 to vector<2x128xf32>
    %253 = arith.subf %252, %245 : vector<2x128xf32>
    %254 = arith.mulf %253, %251 : vector<2x128xf32>
    %255 = arith.mulf %245, %221 : vector<2x128xf32>
    %256 = arith.addf %254, %255 : vector<2x128xf32>
    %c0_71 = arith.constant 0 : index
    %257 = arith.index_cast %c6_i32 : i32 to index
    %c0_72 = arith.constant 0 : index
    %258 = vector.load %arg12[%c0_71, %257, %c0_72] : memref<2x8x128xf32, #tpu.memory_space<vmem>>, vector<2x1x128xf32>
    %259 = vector.shape_cast %258 : vector<2x1x128xf32> to vector<2x128xf32>
    %260 = vector.shape_cast %256 : vector<2x128xf32> to vector<2x1x128xf32>
    tpu.vector_store %arg12[%c0_71, %257, %c0_72], %260 {strides = array<i32>} : memref<2x8x128xf32, #tpu.memory_space<vmem>>, vector<2x1x128xf32>,
    %c7_i32 = arith.constant 7 : i32
    %c0_73 = arith.constant 0 : index
    %261 = arith.index_cast %c7_i32 : i32 to index
    %c0_74 = arith.constant 0 : index
    %262 = vector.load %arg11[%c0_73, %261, %c0_74] : memref<2x8x384xf32, #tpu.memory_space<vmem>>, vector<2x1x384xf32>
    %263 = vector.shape_cast %262 : vector<2x1x384xf32> to vector<2x384xf32>
    %cst_75 = arith.constant dense<0.000000e+00> : vector<2x384xf32>
    %264 = tpu.matmul %256, %11, %cst_75 {dimension_numbers = #tpu.dot_dimension_numbers<[1], [0], [0], [1], [0, 0, 1, 1], [], []>} : vector<2x128xf32>, vector<128x384xf32>, vector<2x384xf32> -> vector<2x384xf32>
    %265 = vector.extract_strided_slice %263 {offsets = [0, 0], sizes = [2, 128], strides = [1, 1]} : vector<2x384xf32> to vector<2x128xf32>
    %266 = vector.extract_strided_slice %264 {offsets = [0, 0], sizes = [2, 128], strides = [1, 1]} : vector<2x384xf32> to vector<2x128xf32>
    %267 = arith.addf %265, %266 : vector<2x128xf32>
    %268 = arith.negf %267 : vector<2x128xf32>
    %269 = math.exp %268 : vector<2x128xf32>
    %cst_76 = arith.constant 1.000000e+00 : f32
    %270 = vector.broadcast %cst_76 : f32 to vector<2x128xf32>
    %271 = arith.addf %270, %269 : vector<2x128xf32>
    %272 = arith.divf %270, %271 : vector<2x128xf32>
    %273 = vector.extract_strided_slice %263 {offsets = [0, 128], sizes = [2, 128], strides = [1, 1]} : vector<2x384xf32> to vector<2x128xf32>
    %274 = vector.extract_strided_slice %264 {offsets = [0, 128], sizes = [2, 128], strides = [1, 1]} : vector<2x384xf32> to vector<2x128xf32>
    %275 = arith.addf %273, %274 : vector<2x128xf32>
    %276 = arith.negf %275 : vector<2x128xf32>
    %277 = math.exp %276 : vector<2x128xf32>
    %cst_77 = arith.constant 1.000000e+00 : f32
    %278 = vector.broadcast %cst_77 : f32 to vector<2x128xf32>
    %279 = arith.addf %278, %277 : vector<2x128xf32>
    %280 = arith.divf %278, %279 : vector<2x128xf32>
    %281 = vector.extract_strided_slice %263 {offsets = [0, 256], sizes = [2, 128], strides = [1, 1]} : vector<2x384xf32> to vector<2x128xf32>
    %282 = vector.extract_strided_slice %264 {offsets = [0, 256], sizes = [2, 128], strides = [1, 1]} : vector<2x384xf32> to vector<2x128xf32>
    %283 = arith.addf %282, %14 : vector<2x128xf32>
    %284 = arith.mulf %272, %283 : vector<2x128xf32>
    %285 = arith.addf %281, %284 : vector<2x128xf32>
    %286 = math.tanh %285 : vector<2x128xf32>
    %cst_78 = arith.constant 1.000000e+00 : f32
    %287 = vector.broadcast %cst_78 : f32 to vector<2x128xf32>
    %288 = arith.subf %287, %280 : vector<2x128xf32>
    %289 = arith.mulf %288, %286 : vector<2x128xf32>
    %290 = arith.mulf %280, %256 : vector<2x128xf32>
    %291 = arith.addf %289, %290 : vector<2x128xf32>
    %c0_79 = arith.constant 0 : index
    %292 = arith.index_cast %c7_i32 : i32 to index
    %c0_80 = arith.constant 0 : index
    %293 = vector.load %arg12[%c0_79, %292, %c0_80] : memref<2x8x128xf32, #tpu.memory_space<vmem>>, vector<2x1x128xf32>
    %294 = vector.shape_cast %293 : vector<2x1x128xf32> to vector<2x128xf32>
    %295 = vector.shape_cast %291 : vector<2x128xf32> to vector<2x1x128xf32>
    tpu.vector_store %arg12[%c0_79, %292, %c0_80], %295 {strides = array<i32>} : memref<2x8x128xf32, #tpu.memory_space<vmem>>, vector<2x1x128xf32>,
    %c8_i32 = arith.constant 8 : i32
    %c0_81 = arith.constant 0 : index
    %c0_82 = arith.constant 0 : index
    %296 = vector.load %arg10[%c0_81, %c0_82] : memref<2x128xf32, #tpu.memory_space<vmem>>, vector<2x128xf32>
    tpu.vector_store %arg10[%c0_81, %c0_82], %291 {strides = array<i32>} : memref<2x128xf32, #tpu.memory_space<vmem>>, vector<2x128xf32>,
    %c0_83 = arith.constant 0 : index
    %c0_84 = arith.constant 0 : index
    %c0_85 = arith.constant 0 : index
    %297 = vector.load %arg12[%c0_83, %c0_84, %c0_85] : memref<2x8x128xf32, #tpu.memory_space<vmem>>, vector<2x8x128xf32>
    %c0_86 = arith.constant 0 : index
    %c0_87 = arith.constant 0 : index
    %298 = vector.load %arg7[%c0_86, %c0_87] : memref<128x128xf32, #tpu.memory_space<vmem>>, vector<128x128xf32>
    "tpu.trace_start"() <{level = 10 : i32, message = "bth,ho->bto"}> : () -> ()
    %cst_88 = arith.constant dense<0.000000e+00> : vector<2x8x128xf32>
    %299 = tpu.matmul %297, %298, %cst_88 {dimension_numbers = #tpu.dot_dimension_numbers<[2], [0], [0, 1], [1], [0, 0, 0, 1, 1, 1], [], []>} : vector<2x8x128xf32>, vector<128x128xf32>, vector<2x8x128xf32> -> vector<2x8x128xf32>
    "tpu.trace_stop"() : () -> ()
    %c0_89 = arith.constant 0 : index
    %c0_90 = arith.constant 0 : index
    %300 = vector.load %arg8[%c0_89, %c0_90] : memref<1x128xf32, #tpu.memory_space<vmem>>, vector<1x128xf32>
    %301 = vector.shape_cast %300 : vector<1x128xf32> to vector<1x1x128xf32>
    %302 = vector.broadcast %301 : vector<1x1x128xf32> to vector<2x8x128xf32>
    %303 = arith.addf %299, %302 : vector<2x8x128xf32>
    %c0_91 = arith.constant 0 : index
    %c0_92 = arith.constant 0 : index
    %c0_93 = arith.constant 0 : index
    %304 = vector.load %arg9[%c0_91, %c0_92, %c0_93] : memref<2x8x128xf32, #tpu.memory_space<vmem>>, vector<2x8x128xf32>
    tpu.vector_store %arg9[%c0_91, %c0_92, %c0_93], %303 {strides = array<i32>} : memref<2x8x128xf32, #tpu.memory_space<vmem>>, vector<2x8x128xf32>,
    return
  }
  func.func @transform_0(%arg0: i32, %arg1: i32) -> (i32, i32, i32) {
    %c0_i32 = arith.constant 0 : i32
    %c0_i32_0 = arith.constant 0 : i32
    return %arg0, %arg1, %c0_i32 : i32, i32, i32
  }
  func.func @transform_1(%arg0: i32, %arg1: i32) -> (i32, i32) {
    %c0_i32 = arith.constant 0 : i32
    %c0_i32_0 = arith.constant 0 : i32
    %c0_i32_1 = arith.constant 0 : i32
    return %c0_i32, %c0_i32_0 : i32, i32
  }
  func.func @transform_2(%arg0: i32, %arg1: i32) -> (i32, i32) {
    %c0_i32 = arith.constant 0 : i32
    %c0_i32_0 = arith.constant 0 : i32
    %c0_i32_1 = arith.constant 0 : i32
    return %c0_i32, %c0_i32_0 : i32, i32
  }
  func.func @transform_3(%arg0: i32, %arg1: i32) -> (i32, i32) {
    %c0_i32 = arith.constant 0 : i32
    %c0_i32_0 = arith.constant 0 : i32
    %c0_i32_1 = arith.constant 0 : i32
    return %c0_i32, %c0_i32_0 : i32, i32
  }
  func.func @transform_4(%arg0: i32, %arg1: i32) -> (i32, i32) {
    %c0_i32 = arith.constant 0 : i32
    %c0_i32_0 = arith.constant 0 : i32
    %c0_i32_1 = arith.constant 0 : i32
    return %c0_i32, %c0_i32_0 : i32, i32
  }
  func.func @transform_5(%arg0: i32, %arg1: i32) -> (i32, i32) {
    %c0_i32 = arith.constant 0 : i32
    %c0_i32_0 = arith.constant 0 : i32
    %c0_i32_1 = arith.constant 0 : i32
    return %c0_i32, %c0_i32_0 : i32, i32
  }
  func.func @transform_6(%arg0: i32, %arg1: i32) -> (i32, i32) {
    %c0_i32 = arith.constant 0 : i32
    %c0_i32_0 = arith.constant 0 : i32
    %c0_i32_1 = arith.constant 0 : i32
    return %c0_i32, %c0_i32_0 : i32, i32
  }
  func.func @transform_7(%arg0: i32, %arg1: i32) -> (i32, i32, i32) {
    %c0_i32 = arith.constant 0 : i32
    %c0_i32_0 = arith.constant 0 : i32
    return %arg0, %arg1, %c0_i32 : i32, i32, i32
  }
  func.func @transform_8(%arg0: i32, %arg1: i32) -> (i32, i32) {
    %c0_i32 = arith.constant 0 : i32
    %c0_i32_0 = arith.constant 0 : i32
    return %arg0, %c0_i32 : i32, i32
  }
}

</mosaic_0001>

<bundles_post_ra>
// kernel: gru_rnn_forward.1
= control target key start
LH: loop header
LB: loop body
LE: loop exit
PB: predicated region body
PF: predicated region fallthrough
CT: control target
= control target key end

     0   :  { %14 = vsyncpa [#allocation5], 0  ;;  %s4971_s0 = inlined_call_operand.hbm [shape: f32[2,8,4], index: 0, kind: input, shape index: {}]   ;;  %s4972_s1 = inlined_call_operand.hbm [shape: f32[4,384], index: 1, kind: input, shape index: {}]   ;;  %s4973_s2 = inlined_call_operand.hbm [shape: f32[128,384], index: 2, kind: input, shape index: {}]   ;;  %s4974_s3 = inlined_call_operand.hbm [shape: f32[1,384], index: 3, kind: input, shape index: {}]   ;;  %s4975_s4 = inlined_call_operand.hbm [shape: f32[1,128], index: 4, kind: input, shape index: {}]   ;;  %s4976_s5 = inlined_call_operand.hbm [shape: f32[128,128], index: 5, kind: input, shape index: {}]   ;;  %s4977_s6 = inlined_call_operand.hbm [shape: f32[1,128], index: 6, kind: input, shape index: {}]   ;;  %s4978_s7 = inlined_call_operand.hbm [shape: f32[2,8,128], index: 7, kind: output, shape index: {0}]   ;;  %s4979_s8 = inlined_call_operand.hbm [shape: f32[2,128], index: 8, kind: output, shape index: {1}]  }
   0x1   :  { %15 = vsyncpa [#allocation8], 0 }
   0x2   :  { %16 = vsyncpa [#allocation11], 0 }
   0x3   :  { %17 = vsyncpa [#allocation14], 0 }
   0x4   :  { %18 = vsyncpa [#allocation6], 0 }
   0x5   :  { %19 = vsyncpa [#allocation18], 0  ;;  %s4267_s27 = smov [#allocation7]   ;;  %s4268_s29 = smov [#allocation10]  }
   0x6   :  { %s38_s28 = sshll.u32 %s4267_s27, 4  ;;  %s60_s30 = sshll.u32 %s4268_s29, 4  ;;  %s39_s28 = int_to_ptr.vmem [resolvable:$true] %s38_s28  ;;  %s61_s30 = int_to_ptr.vmem [resolvable:$true] %s60_s30 }
   0x7   :  { %s4057_s11 = scalar_lea.hbm %s4972_s1, 192 }
   0x8   :  { %p4058_p0 = scmp.ne.s32.totalorder %s4972_s1, %s4057_s11  ;;  %p4061_p1 = scmp.lt.u32.totalorder %s4057_s11, %s4972_s1 }
   0xa   :  { %p4063_p2 = pnand %p4061_p1, %p4058_p0 }
   0xc   :  { %4066 = shalt.err (!%p4063_p2)
}
   0xd   :  { %s4067_s16 = scalar_lea.vmem %s39_s28, 192  ;;  %p4072_p4 = scmp.lt.s32.totalorder %s39_s28, %s39_s28 }
   0xe   :  { %p4068_p3 = scmp.ne.s32.totalorder %s39_s28, %s4067_s16  ;;  %p4073_p5 = scmp.lt.s32.totalorder %s4067_s16, %s4067_s16 }
  0x10   :  { %p4074_p6 = por %p4073_p5, %p4072_p4 }
  0x12   :  { %p4075_p7 = pnand %p4074_p6, %p4068_p3 }
  0x14   :  { %4078 = shalt.err (!%p4075_p7)
}
  0x15   :  { %41 = dma.hbm_to_vmem [thread:$0]  %s4972_s1, 192, %s39_s28, [#allocation8]  }
  0x16   :  { %s4079_s21 = scalar_lea.hbm %s4974_s3, 48 }
  0x17   :  { %p4080_p8 = scmp.ne.s32.totalorder %s4974_s3, %s4079_s21  ;;  %p4083_p9 = scmp.lt.u32.totalorder %s4079_s21, %s4974_s3 }
  0x19   :  { %p4085_p10 = pnand %p4083_p9, %p4080_p8 }
  0x1b   :  { %4088 = shalt.err (!%p4085_p10)
}
  0x1c   :  { %s4089_s26 = scalar_lea.vmem %s61_s30, 48  ;;  %s4093_s27 = scalar_lea.vmem %s61_s30, 64 }
  0x1d   :  { %p4090_p11 = scmp.ne.s32.totalorder %s61_s30, %s4089_s26  ;;  %p4094_p12 = scmp.lt.s32.totalorder %s61_s30, %s61_s30 }
  0x1e   :  { %p4095_p13 = scmp.lt.s32.totalorder %s4093_s27, %s4089_s26 }
  0x20   :  { %p4096_p0 = por %p4095_p13, %p4094_p12 }
  0x22   :  { %p4097_p1 = pnand %p4096_p0, %p4090_p11 }
  0x24   :  { %4100 = shalt.err (!%p4097_p1)
}
  0x25   :  { %63 = dma.hbm_to_vmem [thread:$0]  %s4974_s3, 48, %s61_s30, [#allocation11]  }
  0x26   :  { %s4269_s29 = smov [#allocation13]   ;;  %s4270_s10 = smov [#allocation4]  }
  0x27   :  { %s79_s9 = sshll.u32 %s4269_s29, 4  ;;  %s25_s11 = sshll.u32 %s4270_s10, 4  ;;  %s80_s9 = int_to_ptr.vmem [resolvable:$true] %s79_s9  ;;  %s4353_s11 = int_to_ptr.vmem [resolvable:$true] %s25_s11 }
  0x28   :  { %s4101_s14 = scalar_lea.hbm %s4976_s5, 2048 }
  0x29   :  { %p4102_p2 = scmp.ne.s32.totalorder %s4976_s5, %s4101_s14  ;;  %p4105_p3 = scmp.lt.u32.totalorder %s4101_s14, %s4976_s5 }
  0x2b   :  { %p4107_p4 = pnand %p4105_p3, %p4102_p2 }
  0x2d   :  { %4110 = shalt.err (!%p4107_p4)
}
  0x2e   :  { %s4111_s3 = scalar_lea.vmem %s80_s9, 2048  ;;  %p4116_p6 = scmp.lt.s32.totalorder %s80_s9, %s80_s9 }
  0x2f   :  { %p4112_p5 = scmp.ne.s32.totalorder %s80_s9, %s4111_s3  ;;  %p4117_p7 = scmp.lt.s32.totalorder %s4111_s3, %s4111_s3 }
  0x31   :  { %p4118_p8 = por %p4117_p7, %p4116_p6 }
  0x33   :  { %p4119_p9 = pnand %p4118_p8, %p4112_p5 }
  0x35   :  { %4122 = shalt.err (!%p4119_p9)
}
  0x36   :  { %s4271_s30 = smov 128   ;;  %s4272_s19 = smov 8  }
  0x37   :  { %85 = dma.hbm_to_vmem [thread:$0]  %s4976_s5, 2048, %s80_s9, [#allocation14], %s4271_s30, %s4271_s30, %s4272_s19  }
  0x38   :  { %s4123_s24 = scalar_lea.hbm %s4971_s0, 256 }
  0x39   :  { %p4124_p10 = scmp.ne.s32.totalorder %s4971_s0, %s4123_s24  ;;  %p4127_p11 = scmp.lt.u32.totalorder %s4123_s24, %s4971_s0 }
  0x3b   :  { %p4129_p12 = pnand %p4127_p11, %p4124_p10 }
  0x3d   :  { %4132 = shalt.err (!%p4129_p12)
}
  0x3e   :  { %s4133_s28 = scalar_lea.vmem %s4353_s11, 256  ;;  %p4138_p0 = scmp.lt.s32.totalorder %s4353_s11, %s4353_s11 }
  0x3f   :  { %p4134_p13 = scmp.ne.s32.totalorder %s4353_s11, %s4133_s28  ;;  %p4139_p1 = scmp.lt.s32.totalorder %s4133_s28, %s4133_s28 }
  0x41   :  { %p4140_p2 = por %p4139_p1, %p4138_p0 }
  0x43   :  { %p4141_p3 = pnand %p4140_p2, %p4134_p13 }
  0x45   :  { %4144 = shalt.err (!%p4141_p3)
}
  0x46   :  { %31 = dma.hbm_to_vmem [thread:$0]  %s4971_s0, 256, %s4353_s11, [#allocation5], %s4271_s30, %s4271_s30, %s4272_s19  }
  0x47   :  { %s4273_s9 = smov [#allocation9]   ;;  %s4145_s14 = scalar_lea.hbm %s4973_s2, 6144 }
  0x48   :  { %s47_s10 = sshll.u32 %s4273_s9, 4  ;;  %p4146_p4 = scmp.ne.s32.totalorder %s4973_s2, %s4145_s14  ;;  %s48_s10 = int_to_ptr.vmem [resolvable:$true] %s47_s10 }
  0x49   :  { %p4149_p5 = scmp.lt.u32.totalorder %s4145_s14, %s4973_s2 }
  0x4b   :  { %p4151_p6 = pnand %p4149_p5, %p4146_p4 }
  0x4d   :  { %4154 = shalt.err (!%p4151_p6)
}
  0x4e   :  { %s4155_s3 = scalar_lea.vmem %s48_s10, 6144  ;;  %p4160_p8 = scmp.lt.s32.totalorder %s48_s10, %s48_s10 }
  0x4f   :  { %p4156_p7 = scmp.ne.s32.totalorder %s48_s10, %s4155_s3  ;;  %p4161_p9 = scmp.lt.s32.totalorder %s4155_s3, %s4155_s3 }
  0x51   :  { %p4162_p10 = por %p4161_p9, %p4160_p8 }
  0x53   :  { %p4163_p11 = pnand %p4162_p10, %p4156_p7 }
  0x55   :  { %4166 = shalt.err (!%p4163_p11)
}
  0x56   :  { %s4274_s0 = smov 384   ;;  %s4275_s11 = smov 24  }
  0x57   :  { %53 = dma.hbm_to_vmem [thread:$0]  %s4973_s2, 6144, %s48_s10, [#allocation8], %s4274_s0, %s4274_s0, %s4275_s11  }
  0x58   :  { %s4276_s22 = smov [#allocation12]   ;;  %s4277_s24 = smov [#allocation15]  }
  0x59   :  { %s70_s23 = sshll.u32 %s4276_s22, 4  ;;  %s92_s25 = sshll.u32 %s4277_s24, 4  ;;  %s71_s23 = int_to_ptr.vmem [resolvable:$true] %s70_s23  ;;  %s93_s25 = int_to_ptr.vmem [resolvable:$true] %s92_s25 }
  0x5a   :  { %s4167_s1 = scalar_lea.hbm %s4975_s4, 16 }
  0x5b   :  { %p4168_p12 = scmp.ne.s32.totalorder %s4975_s4, %s4167_s1  ;;  %p4171_p13 = scmp.lt.u32.totalorder %s4167_s1, %s4975_s4 }
  0x5d   :  { %p4173_p0 = pnand %p4171_p13, %p4168_p12 }
  0x5f   :  { %4176 = shalt.err (!%p4173_p0)
}
  0x60   :  { %s4177_s2 = scalar_lea.vmem %s71_s23, 16  ;;  %s4181_s10 = scalar_lea.vmem %s71_s23, 32 }
  0x61   :  { %p4178_p1 = scmp.ne.s32.totalorder %s71_s23, %s4177_s2  ;;  %p4182_p2 = scmp.lt.s32.totalorder %s71_s23, %s71_s23 }
  0x62   :  { %p4183_p3 = scmp.lt.s32.totalorder %s4181_s10, %s4177_s2 }
  0x64   :  { %p4184_p4 = por %p4183_p3, %p4182_p2 }
  0x66   :  { %p4185_p5 = pnand %p4184_p4, %p4178_p1 }
  0x68   :  { %4188 = shalt.err (!%p4185_p5)
}
  0x69   :  { %73 = dma.hbm_to_vmem [thread:$0]  %s4975_s4, 16, %s71_s23, [#allocation11]  }
  0x6a   :  { %s4189_s16 = scalar_lea.hbm %s4977_s6, 16 }
  0x6b   :  { %p4190_p6 = scmp.ne.s32.totalorder %s4977_s6, %s4189_s16  ;;  %p4193_p7 = scmp.lt.u32.totalorder %s4189_s16, %s4977_s6 }
  0x6d   :  { %p4195_p8 = pnand %p4193_p7, %p4190_p6 }
  0x6f   :  { %4198 = shalt.err (!%p4195_p8)
}
  0x70   :  { %s4199_s11 = scalar_lea.vmem %s93_s25, 16  ;;  %s4203_s20 = scalar_lea.vmem %s93_s25, 32 }
  0x71   :  { %p4200_p9 = scmp.ne.s32.totalorder %s93_s25, %s4199_s11  ;;  %p4204_p10 = scmp.lt.s32.totalorder %s93_s25, %s93_s25 }
  0x72   :  { %p4205_p11 = scmp.lt.s32.totalorder %s4203_s20, %s4199_s11 }
  0x74   :  { %p4206_p12 = por %p4205_p11, %p4204_p10 }
  0x76   :  { %p4207_p13 = pnand %p4206_p12, %p4200_p9 }
  0x78   :  { %4210 = shalt.err (!%p4207_p13)
}
  0x79   :  { %95 = dma.hbm_to_vmem [thread:$0]  %s4977_s6, 16, %s93_s25, [#allocation14]  }
  0x7a   :  { %4255 = dma.done.wait [#allocation5], 256  }
  0x7b   :  { %4256 = vsyncadd [#allocation5], 4294967040 }
  0x7c   :  { %4257 = dma.done.wait [#allocation8], 6336  }
  0x7d   :  { %4258 = vsyncadd [#allocation8], 4294960960 }
  0x7e   :  { %4259 = dma.done.wait [#allocation11], 64  }
  0x7f   :  { %4260 = vsyncadd [#allocation11], 4294967232 }
  0x80   :  { %4261 = dma.done.wait [#allocation14], 2064  }
  0x81   :  { %4262 = vsyncadd [#allocation14], 4294965232  ;;  %v4278_v0 = vmov 0.0   ;;  %v319_v1 = vld [vmem:[#allocation9 + $0x8] sm:$0xff]  ;;  %v322_v2 = vld [vmem:[#allocation9 + $0x20] sm:$0xff]  ;;  %vm153_vm0 = vcmask 1043456  }
  0x82   :  { %224 = vmatprep.mubr.f32.mxu1 %v4278_v0  ;;  %121 = vst [vmem:[#allocation17] sm:$0x3] %v4278_v0  ;;  %441 = vmatprep.mubr.f32.mxu0 %v4278_v0  ;;  %v318_v3 = vld [vmem:[#allocation9] sm:$0xff]  ;;  %v4429_v4 = vpack.c.bf16 %v322_v2, %v319_v1  ;;  %v321_v5 = vld [vmem:[#allocation9 + $0x18] sm:$0xff]  ;;  %v328_v7 = vld [vmem:[#allocation9 + $0x50] sm:$0xff]  ;;  %vm146_vm1 = vcmask 31744  }
  0x83   :  { %v325_v6 = vld [vmem:[#allocation9 + $0x38] sm:$0xff]  ;;  %v4431_v8 = vpack.c.bf16 %v321_v5, %v318_v3  ;;  %v324_v10 = vld [vmem:[#allocation9 + $0x30] sm:$0xff]  ;;  %v327_v11 = vld [vmem:[#allocation9 + $0x48] sm:$0xff]  ;;  %v4279_v31 = vmov 0.0|0.0   ;;  %vm4280_vm2 = vmmov 0   ;;  %s4282_s6 = smov [#allocation17]  }
  0x84   :  { %v4433_v9 = vpack.c.bf16 %v328_v7, %v325_v6  ;;  %v124_v12 = vld [vmem:[#allocation7] sm:$0xff]  ;;  %3399 = vmatprep.subr.bf16.mxu0 %v4429_v4  ;;  %v331_v14 = vld [vmem:[#allocation9 + $0x68] sm:$0xff]  ;;  %v334_v15 = vld [vmem:[#allocation9 + $0x80] sm:$0xff]  ;;  %v4437_v16 = vpack.c.bf16 %v327_v11, %v324_v10  ;;  %s2863_s22 = sshll.u32 %s4282_s6, 4  ;;  %s2864_s22 = int_to_ptr.vmem [resolvable:$true] %s2863_s22 }
  0x85   :  { %v145_v13 = vcombine.high %v124_v12, %v124_v12  ;;  %3401 = vmatpush1.bf16.msra.mxu0 %v4431_v8  ;;  %v122_v17 = vld [vmem:[#allocation4] sm:$0xff]  ;;  %v4441_v18 = vpack.c.bf16 %v334_v15, %v331_v14  ;;  %v333_v20 = vld [vmem:[#allocation9 + $0x78] sm:$0xff]  ;;  %v340_v22 = vld [vmem:[#allocation9 + $0xb0] sm:$0xff]  ;;  %s4211_s23 = scalar_lea.vmem %s2864_s22, 32  ;;  %p4216_p1 = scmp.lt.s32.totalorder %s2864_s22, %s2864_s22 }
  0x86   :  { %3403 = vmatprep.subr.bf16.mxu0 %v4433_v9  ;;  %v330_v19 = vld [vmem:[#allocation9 + $0x60] sm:$0xff]  ;;  %v337_v21 = vld [vmem:[#allocation9 + $0x98] sm:$0xff]  ;;  %v123_v25 = vld [vmem:[#allocation4 + $0x8] sm:$0xff]  ;;  %p4212_p0 = scmp.ne.s32.totalorder %s2864_s22, %s4211_s23  ;;  %p4217_p2 = scmp.lt.s32.totalorder %s4211_s23, %s4211_s23 }
  0x87   :  { %2879 = vmatprep.subr.msk.mxu1 %vm153_vm0, %v145_v13  ;;  %v125_v23 = vld [vmem:[#allocation7 + $0x8] sm:$0xf]  ;;  %v4447_v24 = vpack.c.bf16 %v333_v20, %v330_v19  ;;  %v4451_v26 = vpack.c.bf16 %v340_v22, %v337_v21  ;;  %v336_v27 = vld [vmem:[#allocation9 + $0x90] sm:$0xff]  ;;  %v339_v28 = vld [vmem:[#allocation9 + $0xa8] sm:$0xff]  ;;  %v128_v22 = vlaneseq }
  0x88   :  { %2880 = vmatpush1.msk.msra.mxu1 %vm153_vm0, %v124_v12  ;;  %v343_v29 = vld [vmem:[#allocation9 + $0xc8] sm:$0xff]  ;;  %v346_v30 = vld [vmem:[#allocation9 + $0xe0] sm:$0xff]  ;;  %v320_v32 = vld [vmem:[#allocation9 + $0x10] sm:$0xff]  ;;  %v4457_v34 = vpack.c.bf16 %v339_v28, %v336_v27  ;;  %p4218_p3 = por %p4217_p2, %p4216_p1 }
  0x89   :  { %2881 = vmatmul.mubr.msk.f32.vlgmr.msra.gmra.mrb[0].mxu1 %vm146_vm1, %v122_v17  ;;  %3078 = vmatprep.subr.msk.mxu1 %vm153_vm0, %v125_v23  ;;  %v323_v33 = vld [vmem:[#allocation9 + $0x28] sm:$0xff]  ;;  %v342_v35 = vld [vmem:[#allocation9 + $0xc0] sm:$0xff]  ;;  %v4463_v37 = vpack.c.bf16 %v346_v30, %v343_v29  ;;  %v345_v38 = vld [vmem:[#allocation9 + $0xd8] sm:$0xff] }
  0x8a   :  { %3405 = vmatpush1.bf16.msra.mxu0 %v4437_v16  ;;  %230 = vmatprep.mubr.f32.mxu1 %v4278_v0  ;;  %v4460_v36 = vpack.c.bf16 %v323_v33, %v320_v32  ;;  %v326_v39 = vld [vmem:[#allocation9 + $0x40] sm:$0xff]  ;;  %v329_v40 = vld [vmem:[#allocation9 + $0x58] sm:$0xff]  ;;  %v352_v42 = vld [vmem:[#allocation9 + $0x110] sm:$0xff]  ;;  %v4467_v43 = vpack.c.bf16 %v345_v38, %v342_v35  ;;  %p4219_p4 = pnand %p4218_p3, %p4212_p0 }
  0x8b   :  { %3407 = vmatprep.subr.bf16.mxu0 %v4441_v18  ;;  %3079 = vmatpush3.msk.msra.mxu1 %vm153_vm0, %v125_v23  ;;  %v349_v41 = vld [vmem:[#allocation9 + $0xf8] sm:$0xff]  ;;  %v348_v44 = vld [vmem:[#allocation9 + $0xf0] sm:$0xff]  ;;  %v4470_v45 = vpack.c.bf16 %v329_v40, %v326_v39  ;;  %v351_v47 = vld [vmem:[#allocation9 + $0x108] sm:$0xff]  ;;  %v129_v23 = vshrl.u32 %v128_v22, 7 }
  0x8c   :  { %3430 = vmatprep.subr.bf16.mxu1 %v4279_v31  ;;  %v4473_v46 = vpack.c.bf16 %v352_v42, %v349_v41  ;;  %v332_v48 = vld [vmem:[#allocation9 + $0x70] sm:$0xff]  ;;  %v335_v49 = vld [vmem:[#allocation9 + $0x88] sm:$0xff]  ;;  %v358_v51 = vld [vmem:[#allocation9 + $0x140] sm:$0xff]  ;;  %v4479_v52 = vpack.c.bf16 %v351_v47, %v348_v44 }
  0x8d   :  { %2882 = vmatmul.mubr.msk.f32.gmra.mrb[2].mxu1 %vm146_vm1, %v123_v25  ;;  %v355_v50 = vld [vmem:[#allocation9 + $0x128] sm:$0xff]  ;;  %v354_v53 = vld [vmem:[#allocation9 + $0x120] sm:$0xff]  ;;  %v4482_v54 = vpack.c.bf16 %v335_v49, %v332_v48  ;;  %v357_v56 = vld [vmem:[#allocation9 + $0x138] sm:$0xff]  ;;  %v134_v28 = vsub.s32 1, %v129_v23  ;;  %v138_v39 = vsub.s32 2, %v129_v23 }
  0x8e   :  { %3409 = vmatpush1.bf16.msra.mxu0 %v4447_v24  ;;  %3080 = vmatprep.mubr.msk.f32.mxu1 %vm146_vm1, %v122_v17  ;;  %v4485_v55 = vpack.c.bf16 %v358_v51, %v355_v50  ;;  %v338_v57 = vld [vmem:[#allocation9 + $0xa0] sm:$0xff]  ;;  %v341_v58 = vld [vmem:[#allocation9 + $0xb8] sm:$0xff]  ;;  %v364_v60 = vld [vmem:[#allocation9 + $0x170] sm:$0xff]  ;;  %v4489_v61 = vpack.c.bf16 %v357_v56, %v354_v53  ;;  %v4281_v53 = vmov 1966171168  }
  0x8f   :  { %3411 = vmatprep.subr.bf16.mxu0 %v4451_v26  ;;  %v361_v59 = vld [vmem:[#allocation9 + $0x158] sm:$0xff]  ;;  %v360_v62 = vld [vmem:[#allocation9 + $0x150] sm:$0xff]  ;;  %v4492_v63 = vpack.c.bf16 %v341_v58, %v338_v57  ;;  %v363_v2 = vld [vmem:[#allocation9 + $0x168] sm:$0xff]  ;;  %v520_v56 = vunpack.c.l.s4 %v4281_v53 }
  0x90   :  { %v4495_v1 = vpack.c.bf16 %v364_v60, %v361_v59  ;;  %v344_v3 = vld [vmem:[#allocation9 + $0xd0] sm:$0xff]  ;;  %v347_v5 = vld [vmem:[#allocation9 + $0xe8] sm:$0xff]  ;;  %v4499_v6 = vpack.c.bf16 %v363_v2, %v360_v62  ;;  %v350_v10 = vld [vmem:[#allocation9 + $0x100] sm:$0xff] }
  0x91   :  { %3081 = vmatmul.mubr.msk.f32.vlgmr.msra.gmra.mrb[4].mxu1 %vm146_vm1, %v123_v25  ;;  %v4502_v7 = vpack.c.bf16 %v347_v5, %v344_v3  ;;  %v353_v11 = vld [vmem:[#allocation9 + $0x118] sm:$0xff]  ;;  %v356_v14 = vld [vmem:[#allocation9 + $0x130] sm:$0xff]  ;;  %v359_v15 = vld [vmem:[#allocation9 + $0x148] sm:$0xff]  ;;  %v130_v25 = vsub.s32 0, %v129_v23  ;;  %v521_v57 = vunpack.c.0.s8 %v520_v56 }
  0x92   :  { %3413 = vmatpush1.bf16.msra.mxu0 %v4457_v34  ;;  %3432 = vmatpush3.bf16.msra.mxu1 %v4460_v36  ;;  %v4507_v12 = vld [vmem:[#allocation17] sm:$0x3]  ;;  %v4510_v13 = vpack.c.bf16 %v353_v11, %v350_v10  ;;  %v4516_v17 = vpack.c.bf16 %v359_v15, %v356_v14  ;;  %v362_v19 = vld [vmem:[#allocation9 + $0x160] sm:$0xff] }
  0x93   :  { %3415 = vmatprep.subr.bf16.mxu0 %v4463_v37  ;;  %3433 = vmatprep.subr.bf16.mxu1 %v4279_v31  ;;  %v365_v20 = vld [vmem:[#allocation9 + $0x178] sm:$0xff]  ;;  %v126_v27 = vld [vmem:[#allocation10] sm:$0x7]  ;;  %v4561_v58 = vsub.s32 %v521_v57, %v129_v23 }
  0x94   :  { %3115 = vmatprep.mubr.msk.f32.mxu1 %vm4280_vm2, %v4278_v0  ;;  %v4523_v21 = vpack.c.bf16 %v365_v20, %v362_v19  ;;  %v131_v29 = vrot.slane %v126_v27, %v130_v25  ;;  %v135_v30 = vrot.slane %v126_v27, %v134_v28  ;;  %v139_v47 = vrot.slane %v126_v27, %v138_v39 }
  0x96   :  { %3417 = vmatpush1.bf16.msra.mxu0 %v4467_v43  ;;  %3435 = vmatpush3.bf16.msra.mxu1 %v4470_v45 }
  0x97   :  { %3419 = vmatprep.subr.bf16.mxu0 %v4473_v46  ;;  %3436 = vmatprep.subr.bf16.mxu1 %v4279_v31 }
  0x9a   :  { %3421 = vmatpush1.bf16.msra.mxu0 %v4479_v52  ;;  %3438 = vmatpush3.bf16.msra.mxu1 %v4482_v54 }
  0x9b   :  { %3423 = vmatprep.subr.bf16.mxu0 %v4485_v55  ;;  %3439 = vmatprep.subr.bf16.mxu1 %v4279_v31 }
  0x9e   :  { %3425 = vmatpush1.bf16.msra.mxu0 %v4489_v61  ;;  %3441 = vmatpush3.bf16.msra.mxu1 %v4492_v63 }
  0x9f   :  { %3427 = vmatprep.subr.bf16.mxu0 %v4495_v1  ;;  %3442 = vmatprep.subr.bf16.mxu1 %v4279_v31 }
  0xa2   :  { %3429 = vmatpush1.bf16.msra.mxu0 %v4499_v6  ;;  %3444 = vmatpush3.bf16.msra.mxu1 %v4502_v7 }
  0xa3   :  { %3445 = vmatprep.subr.bf16.mxu1 %v4279_v31  ;;  %3455 = vmatprep.subr.bf16.mxu0 %v4429_v4 }
  0xa5   :  { %442 = vmatmul.mubr.f32.vlgmr.msra.gmra.mrb[0].mxu0 %v4507_v12 }
  0xa6   :  { %3447 = vmatpush3.bf16.msra.mxu1 %v4510_v13  ;;  %3457 = vmatpush1.bf16.msra.mxu0 %v4431_v8 }
  0xa7   :  { %3448 = vmatprep.subr.bf16.mxu1 %v4279_v31  ;;  %3459 = vmatprep.subr.bf16.mxu0 %v4433_v9 }
  0xa8   :  { %759 = vmatprep.mubr.f32.mxu0 %v4278_v0 }
  0xaa   :  { %3450 = vmatpush3.bf16.msra.mxu1 %v4516_v17  ;;  %3461 = vmatpush1.bf16.msra.mxu0 %v4437_v16 }
  0xab   :  { %3451 = vmatprep.subr.bf16.mxu1 %v4279_v31  ;;  %3463 = vmatprep.subr.bf16.mxu0 %v4441_v18 }
  0xae   :  { %3453 = vmatpush3.bf16.msra.mxu1 %v4523_v21  ;;  %3465 = vmatpush1.bf16.msra.mxu0 %v4447_v24 }
  0xaf   :  { %3486 = vmatprep.subr.bf16.mxu1 %v4279_v31  ;;  %3467 = vmatprep.subr.bf16.mxu0 %v4451_v26 }
  0xb1   :  { %3116 = vmatmul.mubr.f32.vlgmr.msra.gmra.mrb[6].mxu1 %v4507_v12 }
  0xb2   :  { %3488 = vmatpush3.bf16.msra.mxu1 %v4460_v36  ;;  %3469 = vmatpush1.bf16.msra.mxu0 %v4457_v34 }
  0xb3   :  { %3489 = vmatprep.subr.bf16.mxu1 %v4279_v31  ;;  %3471 = vmatprep.subr.bf16.mxu0 %v4463_v37 }
  0xb4   :  { %3150 = vmatprep.mubr.msk.f32.mxu1 %vm4280_vm2, %v4278_v0 }
  0xb6   :  { %3491 = vmatpush3.bf16.msra.mxu1 %v4470_v45  ;;  %3473 = vmatpush1.bf16.msra.mxu0 %v4467_v43 }
  0xb7   :  { %3492 = vmatprep.subr.bf16.mxu1 %v4279_v31  ;;  %3475 = vmatprep.subr.bf16.mxu0 %v4473_v46 }
  0xba   :  { %3494 = vmatpush3.bf16.msra.mxu1 %v4482_v54  ;;  %3477 = vmatpush1.bf16.msra.mxu0 %v4479_v52 }
  0xbb   :  { %3495 = vmatprep.subr.bf16.mxu1 %v4279_v31  ;;  %3479 = vmatprep.subr.bf16.mxu0 %v4485_v55 }
  0xbe   :  { %3497 = vmatpush3.bf16.msra.mxu1 %v4492_v63  ;;  %3481 = vmatpush1.bf16.msra.mxu0 %v4489_v61 }
  0xbf   :  { %3498 = vmatprep.subr.bf16.mxu1 %v4279_v31  ;;  %3483 = vmatprep.subr.bf16.mxu0 %v4495_v1 }
  0xc2   :  { %3500 = vmatpush3.bf16.msra.mxu1 %v4502_v7  ;;  %3485 = vmatpush1.bf16.msra.mxu0 %v4499_v6 }
  0xc3   :  { %3501 = vmatprep.subr.bf16.mxu1 %v4279_v31  ;;  %3511 = vmatprep.subr.bf16.mxu0 %v4429_v4 }
  0xc6   :  { %3503 = vmatpush3.bf16.msra.mxu1 %v4510_v13 }
  0xc7   :  { %3504 = vmatprep.subr.bf16.mxu1 %v4279_v31 }
  0xca   :  { %3506 = vmatpush3.bf16.msra.mxu1 %v4516_v17 }
  0xcb   :  { %3507 = vmatprep.subr.bf16.mxu1 %v4279_v31 }
  0xce   :  { %3509 = vmatpush3.bf16.msra.mxu1 %v4523_v21 }
  0xcf   :  { %3542 = vmatprep.subr.bf16.mxu1 %v4279_v31 }
 0x15c   :  { %v226_v32 = vpop.f32.mrb[0].mxu1 }
 0x15d   :  { %v227_v33 = vadd.f32 %v226_v32, %v131_v29  ;;  %v228_v35 = vpop.f32.mrb[1].mxu1 }
 0x15e   :  { %v229_v38 = vadd.f32 %v228_v35, %v135_v30 }
 0x15f   :  { %312 = vst [vmem:[#allocation2] sm:$0xff] %v227_v33 }
 0x160   :  { %313 = vst [vmem:[#allocation2 + $0x8] sm:$0xff] %v229_v38  ;;  %v232_v40 = vpop.f32.mrb[2].mxu1 }
 0x161   :  { %v233_v41 = vadd.f32 %v232_v40, %v131_v29  ;;  %v234_v42 = vpop.f32.mrb[3].mxu1  ;;  %v4569_v40 = vld [vmem:[#allocation12] ss:$0 sm:$0xff] }
 0x162   :  { %v235_v44 = vadd.f32 %v234_v42, %v135_v30 }
 0x163   :  { %315 = vst [vmem:[#allocation2 + $0x18] sm:$0xff] %v233_v41 }
 0x164   :  { %316 = vst [vmem:[#allocation2 + $0x20] sm:$0xff] %v235_v44  ;;  %v3082_v48 = vpop.f32.mrb[4].mxu1 }
 0x165   :  { %v309_v49 = vadd.f32 %v3082_v48, %v139_v47  ;;  %v303_v50 = vpop.f32.mrb[5].mxu1 }
 0x166   :  { %v304_v51 = vadd.f32 %v303_v50, %v139_v47 }
 0x167   :  { %317 = vst [vmem:[#allocation2 + $0x28] sm:$0xff] %v309_v49 }
 0x168   :  { %314 = vst [vmem:[#allocation2 + $0x10] sm:$0xff] %v304_v51 }
 0x16e   :  { %v376_v15 = vld [vmem:[#allocation2 + $0x18] ss:$8 sm:$0x7] }
 0x16f   :  { %v374_v3 = vld [vmem:[#allocation2] ss:$8 sm:$0x7]  ;;  %v560_v28 = vrot.slane %v376_v15, 1 }
 0x170   :  { %v559_v22 = vrot.slane %v374_v3, 1 }
 0x178   :  { %v443_v59 = vpop.f32.mrb[0].mxu0 }
 0x179   :  { %v525_v60 = vrot.slane %v443_v59, %v4561_v58  ;;  %v445_v62 = vpop.f32.mrb[1].mxu0 }
 0x17a   :  { %v570_v2 = vrot.slane %v445_v62, %v4561_v58 }
 0x17b   :  { %v526_v5 = vcombine.high %v525_v60, %v525_v60  ;;  %v533_v10 = vrot.slane %v525_v60, %v4561_v58 }
 0x17c   :  { %v571_v11 = vcombine.high %v570_v2, %v570_v2  ;;  %v578_v14 = vrot.slane %v570_v2, %v4561_v58  ;;  %v630_v2 = vrot.slane %v374_v3, 2 }
 0x17d   :  { %v540_v19 = vrot.slane %v526_v5, %v4561_v58  ;;  %v543_v20 = vadd.f32 %v533_v10, %v374_v3 }
 0x17e   :  { %v585_v23 = vrot.slane %v571_v11, %v4561_v58  ;;  %v588_v29 = vadd.f32 %v578_v14, %v559_v22  ;;  %v631_v11 = vrot.slane %v376_v15, 2  ;;  %v649_v22 = vrot.slane %v4507_v12, %v4561_v58 }
 0x17f   :  { %v544_v25 = vadd.f32 %v540_v19, %v376_v15  ;;  %v2887_v27 = vmul.f32 -1.442695, %v543_v20 }
 0x180   :  { %v589_v32 = vadd.f32 %v585_v23, %v560_v28  ;;  %v2889_v33 = vmul.f32 -1.442695, %v588_v29  ;;  %v650_v23 = vcombine.high %v649_v22, %v649_v22 }
 0x181   :  { %3896 = vpow2.f32 %v2887_v27  ;;  %v2888_v30 = vmul.f32 -1.442695, %v544_v25  ;;  %v657_v27 = vrot.slane %v649_v22, %v4561_v58 }
 0x182   :  { %v2890_v39 = vmul.f32 -1.442695, %v589_v32  ;;  %v664_v3 = vrot.slane %v650_v23, %v4561_v58 }
 0x183   :  { %3898 = vpow2.f32 %v2888_v30 }
 0x184   :  { %v514_v35 = vpop.f32.mrb[6].mxu1  ;;  %3900 = vpow2.f32 %v2889_v33 }
 0x185   :  { %v3117_v38 = vpop.f32.mrb[7].mxu1  ;;  %3902 = vpow2.f32 %v2890_v39  ;;  %v602_v42 = vadd.f32 %v4569_v40, %v514_v35 }
 0x187   :  { %v610_v49 = vrot.slane %v602_v42, %v4561_v58 }
 0x189   :  { %v611_v51 = vcombine.high %v610_v49, %v610_v49  ;;  %v618_v57 = vrot.slane %v610_v49, %v4561_v58 }
 0x18b   :  { %v3897_v41 = vpop.eup %3896  ;;  %v625_v60 = vrot.slane %v611_v51, %v4561_v58 }
 0x18c   :  { %v551_v44 = vadd.f32 1.0, %v3897_v41 }
 0x18d   :  { %v3899_v47 = vpop.eup %3898 }
 0x18e   :  { %v552_v48 = vadd.f32 1.0, %v3899_v47  ;;  %3904 = vrcp.f32 %v551_v44  ;;  %v3901_v50 = vpop.eup %3900 }
 0x18f   :  { %v3903_v53 = vpop.eup %3902  ;;  %v596_v56 = vadd.f32 1.0, %v3901_v50 }
 0x190   :  { %3906 = vrcp.f32 %v552_v48  ;;  %v597_v59 = vadd.f32 1.0, %v3903_v53 }
 0x191   :  { %3908 = vrcp.f32 %v596_v56 }
 0x192   :  { %3910 = vrcp.f32 %v597_v59 }
 0x198   :  { %v3905_v62 = vpop.eup %3904 }
 0x199   :  { %v628_v5 = vmul.f32 %v3905_v62, %v618_v57  ;;  %v674_v57 = vld [vmem:[#allocation2 + $0x1] ss:$8 sm:$0x7] }
 0x19a   :  { %v3907_v10 = vpop.eup %3906 }
 0x19b   :  { %v629_v14 = vmul.f32 %v3907_v10, %v625_v60  ;;  %v634_v19 = vadd.f32 %v630_v2, %v628_v5  ;;  %v3909_v25 = vpop.eup %3908  ;;  %v676_v5 = vld [vmem:[#allocation2 + $0x19] ss:$8 sm:$0x7] }
 0x19c   :  { %v3911_v28 = vpop.eup %3910  ;;  %v638_v29 = vsub.f32 1.0, %v3909_v25  ;;  %v667_v33 = vmul.f32 %v3909_v25, %v657_v27  ;;  %v878_v23 = vrot.slane %v676_v5, 1 }
 0x19d   :  { %v635_v20 = vadd.f32 %v631_v11, %v629_v14  ;;  %3912 = vtanh.f32 %v634_v19  ;;  %v639_v32 = vsub.f32 1.0, %v3911_v28  ;;  %v668_v39 = vmul.f32 %v3911_v28, %v664_v3 }
 0x19e   :  { %v877_v14 = vrot.slane %v674_v57, 1 }
 0x19f   :  { %3914 = vtanh.f32 %v635_v20 }
 0x1a7   :  { %v3913_v30 = vpop.eup %3912 }
 0x1a8   :  { %v640_v15 = vmul.f32 %v3913_v30, %v638_v29 }
 0x1a9   :  { %v3915_v35 = vpop.eup %3914 }
 0x1aa   :  { %v641_v38 = vmul.f32 %v3915_v35, %v639_v32  ;;  %v4579_v41 = vadd.f32 %v667_v33, %v640_v15 }
 0x1ac   :  { %v4581_v42 = vadd.f32 %v668_v39, %v641_v38  ;;  %671 = vst [vmem:[#allocation3] sm:$0x1] %v4579_v41 }
 0x1ae   :  { %672 = vst [vmem:[#allocation3 + $0x8] sm:$0x1] %v4581_v42  ;;  %v679_v12 = vcombine.low %v4579_v41, %v4581_v42 }
 0x1b0   :  { %v686_v44 = vrot.slane %v679_v12, %v4561_v58 }
 0x1b2   :  { %v693_v47 = vrot.slane %v686_v44, %v4561_v58 }
 0x1b4   :  { %760 = vmatmul.mubr.f32.vlgmr.msra.gmra.mrb[2].mxu0 %v693_v47  ;;  %3151 = vmatmul.mubr.f32.vlgmr.msra.gmra.mrb[8].mxu1 %v693_v47 }
 0x1b5   :  { %3513 = vmatpush1.bf16.msra.mxu0 %v4431_v8  ;;  %3544 = vmatpush3.bf16.msra.mxu1 %v4460_v36 }
 0x1b6   :  { %3515 = vmatprep.subr.bf16.mxu0 %v4433_v9  ;;  %3545 = vmatprep.subr.bf16.mxu1 %v4279_v31 }
 0x1b7   :  { %1052 = vmatprep.mubr.f32.mxu0 %v4278_v0  ;;  %3185 = vmatprep.mubr.msk.f32.mxu1 %vm4280_vm2, %v4278_v0 }
 0x1b9   :  { %3517 = vmatpush1.bf16.msra.mxu0 %v4437_v16  ;;  %3547 = vmatpush3.bf16.msra.mxu1 %v4470_v45 }
 0x1ba   :  { %3519 = vmatprep.subr.bf16.mxu0 %v4441_v18  ;;  %3548 = vmatprep.subr.bf16.mxu1 %v4279_v31 }
 0x1bd   :  { %3521 = vmatpush1.bf16.msra.mxu0 %v4447_v24  ;;  %3550 = vmatpush3.bf16.msra.mxu1 %v4482_v54 }
 0x1be   :  { %3523 = vmatprep.subr.bf16.mxu0 %v4451_v26  ;;  %3551 = vmatprep.subr.bf16.mxu1 %v4279_v31 }
 0x1c1   :  { %3525 = vmatpush1.bf16.msra.mxu0 %v4457_v34  ;;  %3553 = vmatpush3.bf16.msra.mxu1 %v4492_v63 }
 0x1c2   :  { %3527 = vmatprep.subr.bf16.mxu0 %v4463_v37  ;;  %3554 = vmatprep.subr.bf16.mxu1 %v4279_v31 }
 0x1c5   :  { %3529 = vmatpush1.bf16.msra.mxu0 %v4467_v43  ;;  %3556 = vmatpush3.bf16.msra.mxu1 %v4502_v7 }
 0x1c6   :  { %3531 = vmatprep.subr.bf16.mxu0 %v4473_v46  ;;  %3557 = vmatprep.subr.bf16.mxu1 %v4279_v31 }
 0x1c9   :  { %3533 = vmatpush1.bf16.msra.mxu0 %v4479_v52  ;;  %3559 = vmatpush3.bf16.msra.mxu1 %v4510_v13 }
 0x1ca   :  { %3535 = vmatprep.subr.bf16.mxu0 %v4485_v55  ;;  %3560 = vmatprep.subr.bf16.mxu1 %v4279_v31 }
 0x1cd   :  { %3537 = vmatpush1.bf16.msra.mxu0 %v4489_v61  ;;  %3562 = vmatpush3.bf16.msra.mxu1 %v4516_v17 }
 0x1ce   :  { %3539 = vmatprep.subr.bf16.mxu0 %v4495_v1  ;;  %3563 = vmatprep.subr.bf16.mxu1 %v4279_v31 }
 0x1d1   :  { %3541 = vmatpush1.bf16.msra.mxu0 %v4499_v6  ;;  %3565 = vmatpush3.bf16.msra.mxu1 %v4523_v21 }
 0x1d2   :  { %3567 = vmatprep.subr.bf16.mxu0 %v4429_v4  ;;  %3598 = vmatprep.subr.bf16.mxu1 %v4279_v31 }
 0x287   :  { %v761_v48 = vpop.f32.mrb[2].mxu0  ;;  %v832_v49 = vpop.f32.mrb[8].mxu1 }
 0x288   :  { %v843_v50 = vrot.slane %v761_v48, %v4561_v58  ;;  %v763_v51 = vpop.f32.mrb[3].mxu0  ;;  %v3152_v53 = vpop.f32.mrb[9].mxu1  ;;  %v920_v33 = vadd.f32 %v4569_v40, %v832_v49  ;;  %v949_v49 = vrot.slane %v676_v5, 2 }
 0x289   :  { %v888_v56 = vrot.slane %v763_v51, %v4561_v58  ;;  %v948_v53 = vrot.slane %v674_v57, 2 }
 0x28a   :  { %v844_v59 = vcombine.high %v843_v50, %v843_v50  ;;  %v851_v60 = vrot.slane %v843_v50, %v4561_v58  ;;  %v928_v38 = vrot.slane %v920_v33, %v4561_v58 }
 0x28b   :  { %v889_v62 = vcombine.high %v888_v56, %v888_v56  ;;  %v896_v2 = vrot.slane %v888_v56, %v4561_v58 }
 0x28c   :  { %v858_v10 = vrot.slane %v844_v59, %v4561_v58  ;;  %v861_v11 = vadd.f32 %v851_v60, %v674_v57  ;;  %v929_v44 = vcombine.high %v928_v38, %v928_v38  ;;  %v936_v48 = vrot.slane %v928_v38, %v4561_v58 }
 0x28d   :  { %v903_v19 = vrot.slane %v889_v62, %v4561_v58  ;;  %v906_v25 = vadd.f32 %v896_v2, %v877_v14 }
 0x28e   :  { %v862_v20 = vadd.f32 %v858_v10, %v676_v5  ;;  %v2891_v22 = vmul.f32 -1.442695, %v861_v11  ;;  %v943_v56 = vrot.slane %v929_v44, %v4561_v58 }
 0x28f   :  { %v907_v28 = vadd.f32 %v903_v19, %v878_v23  ;;  %v2893_v3 = vmul.f32 -1.442695, %v906_v25 }
 0x290   :  { %3916 = vpow2.f32 %v2891_v22  ;;  %v2892_v27 = vmul.f32 -1.442695, %v862_v20 }
 0x291   :  { %v2894_v29 = vmul.f32 -1.442695, %v907_v28 }
 0x292   :  { %3918 = vpow2.f32 %v2892_v27 }
 0x293   :  { %3920 = vpow2.f32 %v2893_v3 }
 0x294   :  { %3922 = vpow2.f32 %v2894_v29 }
 0x29a   :  { %v3917_v30 = vpop.eup %3916 }
 0x29b   :  { %v869_v32 = vadd.f32 1.0, %v3917_v30 }
 0x29c   :  { %v3919_v15 = vpop.eup %3918 }
 0x29d   :  { %v870_v35 = vadd.f32 1.0, %v3919_v15  ;;  %3924 = vrcp.f32 %v869_v32  ;;  %v3921_v39 = vpop.eup %3920 }
 0x29e   :  { %v3923_v12 = vpop.eup %3922  ;;  %v914_v47 = vadd.f32 1.0, %v3921_v39  ;;  %v967_v39 = vld [vmem:[#allocation2 + $0x2] ss:$8 sm:$0x7] }
 0x29f   :  { %3926 = vrcp.f32 %v870_v35  ;;  %v915_v50 = vadd.f32 1.0, %v3923_v12 }
 0x2a0   :  { %3928 = vrcp.f32 %v914_v47 }
 0x2a1   :  { %3930 = vrcp.f32 %v915_v50  ;;  %v969_v50 = vld [vmem:[#allocation2 + $0x1a] ss:$8 sm:$0x7] }
 0x2a7   :  { %v3925_v51 = vpop.eup %3924 }
 0x2a8   :  { %v946_v59 = vmul.f32 %v3925_v51, %v936_v48 }
 0x2a9   :  { %v3927_v60 = vpop.eup %3926 }
 0x2aa   :  { %v947_v62 = vmul.f32 %v3927_v60, %v943_v56  ;;  %v952_v2 = vadd.f32 %v948_v53, %v946_v59  ;;  %v3929_v11 = vpop.eup %3928  ;;  %v1170_v56 = vrot.slane %v967_v39, 1 }
 0x2ab   :  { %v3931_v14 = vpop.eup %3930  ;;  %v956_v19 = vsub.f32 1.0, %v3929_v11  ;;  %v960_v57 = vmul.f32 %v3929_v11, %v4579_v41 }
 0x2ac   :  { %v953_v10 = vadd.f32 %v949_v49, %v947_v62  ;;  %3932 = vtanh.f32 %v952_v2  ;;  %v957_v22 = vsub.f32 1.0, %v3931_v14  ;;  %v961_v28 = vmul.f32 %v3931_v14, %v4581_v42 }
 0x2ad   :  { %v1171_v62 = vrot.slane %v969_v50, 1 }
 0x2ae   :  { %3934 = vtanh.f32 %v953_v10 }
 0x2b6   :  { %v3933_v20 = vpop.eup %3932 }
 0x2b7   :  { %v958_v23 = vmul.f32 %v3933_v20, %v956_v19 }
 0x2b8   :  { %v3935_v25 = vpop.eup %3934 }
 0x2b9   :  { %v959_v27 = vmul.f32 %v3935_v25, %v957_v22  ;;  %v4636_v3 = vadd.f32 %v960_v57, %v958_v23 }
 0x2bb   :  { %v4638_v5 = vadd.f32 %v961_v28, %v959_v27  ;;  %964 = vst [vmem:[#allocation3 + $0x1] sm:$0x1] %v4636_v3 }
 0x2bd   :  { %965 = vst [vmem:[#allocation3 + $0x9] sm:$0x1] %v4638_v5  ;;  %v972_v29 = vcombine.low %v4636_v3, %v4638_v5 }
 0x2bf   :  { %v979_v30 = vrot.slane %v972_v29, %v4561_v58 }
 0x2c1   :  { %v986_v32 = vrot.slane %v979_v30, %v4561_v58 }
 0x2c3   :  { %1053 = vmatmul.mubr.f32.vlgmr.msra.gmra.mrb[4].mxu0 %v986_v32  ;;  %3186 = vmatmul.mubr.f32.vlgmr.msra.gmra.mrb[10].mxu1 %v986_v32 }
 0x2c4   :  { %3569 = vmatpush1.bf16.msra.mxu0 %v4431_v8  ;;  %3600 = vmatpush3.bf16.msra.mxu1 %v4460_v36 }
 0x2c5   :  { %3571 = vmatprep.subr.bf16.mxu0 %v4433_v9  ;;  %3601 = vmatprep.subr.bf16.mxu1 %v4279_v31 }
 0x2c6   :  { %1345 = vmatprep.mubr.f32.mxu0 %v4278_v0  ;;  %3220 = vmatprep.mubr.msk.f32.mxu1 %vm4280_vm2, %v4278_v0 }
 0x2c8   :  { %3573 = vmatpush1.bf16.msra.mxu0 %v4437_v16  ;;  %3603 = vmatpush3.bf16.msra.mxu1 %v4470_v45 }
 0x2c9   :  { %3575 = vmatprep.subr.bf16.mxu0 %v4441_v18  ;;  %3604 = vmatprep.subr.bf16.mxu1 %v4279_v31 }
 0x2cc   :  { %3577 = vmatpush1.bf16.msra.mxu0 %v4447_v24  ;;  %3606 = vmatpush3.bf16.msra.mxu1 %v4482_v54 }
 0x2cd   :  { %3579 = vmatprep.subr.bf16.mxu0 %v4451_v26  ;;  %3607 = vmatprep.subr.bf16.mxu1 %v4279_v31 }
 0x2d0   :  { %3581 = vmatpush1.bf16.msra.mxu0 %v4457_v34  ;;  %3609 = vmatpush3.bf16.msra.mxu1 %v4492_v63 }
 0x2d1   :  { %3583 = vmatprep.subr.bf16.mxu0 %v4463_v37  ;;  %3610 = vmatprep.subr.bf16.mxu1 %v4279_v31 }
 0x2d4   :  { %3585 = vmatpush1.bf16.msra.mxu0 %v4467_v43  ;;  %3612 = vmatpush3.bf16.msra.mxu1 %v4502_v7 }
 0x2d5   :  { %3587 = vmatprep.subr.bf16.mxu0 %v4473_v46  ;;  %3613 = vmatprep.subr.bf16.mxu1 %v4279_v31 }
 0x2d8   :  { %3589 = vmatpush1.bf16.msra.mxu0 %v4479_v52  ;;  %3615 = vmatpush3.bf16.msra.mxu1 %v4510_v13 }
 0x2d9   :  { %3591 = vmatprep.subr.bf16.mxu0 %v4485_v55  ;;  %3616 = vmatprep.subr.bf16.mxu1 %v4279_v31 }
 0x2dc   :  { %3593 = vmatpush1.bf16.msra.mxu0 %v4489_v61  ;;  %3618 = vmatpush3.bf16.msra.mxu1 %v4516_v17 }
 0x2dd   :  { %3595 = vmatprep.subr.bf16.mxu0 %v4495_v1  ;;  %3619 = vmatprep.subr.bf16.mxu1 %v4279_v31 }
 0x2e0   :  { %3597 = vmatpush1.bf16.msra.mxu0 %v4499_v6  ;;  %3621 = vmatpush3.bf16.msra.mxu1 %v4523_v21 }
 0x2e1   :  { %3623 = vmatprep.subr.bf16.mxu0 %v4429_v4  ;;  %3654 = vmatprep.subr.bf16.mxu1 %v4279_v31 }
 0x396   :  { %v1054_v41 = vpop.f32.mrb[4].mxu0  ;;  %v1125_v42 = vpop.f32.mrb[10].mxu1 }
 0x397   :  { %v1136_v15 = vrot.slane %v1054_v41, %v4561_v58  ;;  %v1056_v33 = vpop.f32.mrb[5].mxu0  ;;  %v3187_v35 = vpop.f32.mrb[11].mxu1  ;;  %v1213_v57 = vadd.f32 %v4569_v40, %v1125_v42  ;;  %v1242_v42 = vrot.slane %v969_v50, 2 }
 0x398   :  { %v1181_v38 = vrot.slane %v1056_v33, %v4561_v58  ;;  %v1241_v35 = vrot.slane %v967_v39, 2 }
 0x399   :  { %v1137_v12 = vcombine.high %v1136_v15, %v1136_v15  ;;  %v1144_v44 = vrot.slane %v1136_v15, %v4561_v58  ;;  %v1221_v27 = vrot.slane %v1213_v57, %v4561_v58 }
 0x39a   :  { %v1182_v47 = vcombine.high %v1181_v38, %v1181_v38  ;;  %v1189_v48 = vrot.slane %v1181_v38, %v4561_v58 }
 0x39b   :  { %v1151_v51 = vrot.slane %v1137_v12, %v4561_v58  ;;  %v1154_v53 = vadd.f32 %v1144_v44, %v967_v39  ;;  %v1222_v30 = vcombine.high %v1221_v27, %v1221_v27  ;;  %v1229_v41 = vrot.slane %v1221_v27, %v4561_v58 }
 0x39c   :  { %v1196_v59 = vrot.slane %v1182_v47, %v4561_v58  ;;  %v1199_v2 = vadd.f32 %v1189_v48, %v1170_v56 }
 0x39d   :  { %v1155_v60 = vadd.f32 %v1151_v51, %v969_v50  ;;  %v2895_v49 = vmul.f32 -1.442695, %v1154_v53  ;;  %v1236_v38 = vrot.slane %v1222_v30, %v4561_v58 }
 0x39e   :  { %v1200_v11 = vadd.f32 %v1196_v59, %v1171_v62  ;;  %v2897_v14 = vmul.f32 -1.442695, %v1199_v2 }
 0x39f   :  { %3936 = vpow2.f32 %v2895_v49  ;;  %v2896_v10 = vmul.f32 -1.442695, %v1155_v60 }
 0x3a0   :  { %v2898_v19 = vmul.f32 -1.442695, %v1200_v11 }
 0x3a1   :  { %3938 = vpow2.f32 %v2896_v10 }
 0x3a2   :  { %3940 = vpow2.f32 %v2897_v14 }
 0x3a3   :  { %3942 = vpow2.f32 %v2898_v19 }
 0x3a9   :  { %v3937_v20 = vpop.eup %3936 }
 0x3aa   :  { %v1162_v22 = vadd.f32 1.0, %v3937_v20 }
 0x3ab   :  { %v3939_v23 = vpop.eup %3938 }
 0x3ac   :  { %v1163_v25 = vadd.f32 1.0, %v3939_v23  ;;  %3944 = vrcp.f32 %v1162_v22  ;;  %v3941_v28 = vpop.eup %3940 }
 0x3ad   :  { %v3943_v29 = vpop.eup %3942  ;;  %v1207_v32 = vadd.f32 1.0, %v3941_v28  ;;  %v1260_v28 = vld [vmem:[#allocation2 + $0x3] ss:$8 sm:$0x7] }
 0x3ae   :  { %3946 = vrcp.f32 %v1163_v25  ;;  %v1208_v15 = vadd.f32 1.0, %v3943_v29 }
 0x3af   :  { %3948 = vrcp.f32 %v1207_v32 }
 0x3b0   :  { %3950 = vrcp.f32 %v1208_v15  ;;  %v1262_v15 = vld [vmem:[#allocation2 + $0x1b] ss:$8 sm:$0x7] }
 0x3b6   :  { %v3945_v33 = vpop.eup %3944 }
 0x3b7   :  { %v1239_v12 = vmul.f32 %v3945_v33, %v1229_v41 }
 0x3b8   :  { %v3947_v44 = vpop.eup %3946 }
 0x3b9   :  { %v1240_v47 = vmul.f32 %v3947_v44, %v1236_v38  ;;  %v1245_v48 = vadd.f32 %v1241_v35, %v1239_v12  ;;  %v3949_v53 = vpop.eup %3948  ;;  %v1463_v38 = vrot.slane %v1260_v28, 1 }
 0x3ba   :  { %v3951_v56 = vpop.eup %3950  ;;  %v1249_v59 = vsub.f32 1.0, %v3949_v53  ;;  %v1253_v39 = vmul.f32 %v3949_v53, %v4636_v3 }
 0x3bb   :  { %v1246_v51 = vadd.f32 %v1242_v42, %v1240_v47  ;;  %3952 = vtanh.f32 %v1245_v48  ;;  %v1250_v49 = vsub.f32 1.0, %v3951_v56  ;;  %v1254_v11 = vmul.f32 %v3951_v56, %v4638_v5 }
 0x3bc   :  { %v1464_v47 = vrot.slane %v1262_v15, 1 }
 0x3bd   :  { %3954 = vtanh.f32 %v1246_v51 }
 0x3c5   :  { %v3953_v60 = vpop.eup %3952 }
 0x3c6   :  { %v1251_v62 = vmul.f32 %v3953_v60, %v1249_v59 }
 0x3c7   :  { %v3955_v2 = vpop.eup %3954 }
 0x3c8   :  { %v1252_v10 = vmul.f32 %v3955_v2, %v1250_v49  ;;  %v4693_v14 = vadd.f32 %v1253_v39, %v1251_v62 }
 0x3ca   :  { %v4695_v50 = vadd.f32 %v1254_v11, %v1252_v10  ;;  %1257 = vst [vmem:[#allocation3 + $0x2] sm:$0x1] %v4693_v14 }
 0x3cc   :  { %1258 = vst [vmem:[#allocation3 + $0xa] sm:$0x1] %v4695_v50  ;;  %v1265_v19 = vcombine.low %v4693_v14, %v4695_v50 }
 0x3ce   :  { %v1272_v20 = vrot.slane %v1265_v19, %v4561_v58 }
 0x3d0   :  { %v1279_v22 = vrot.slane %v1272_v20, %v4561_v58 }
 0x3d2   :  { %1346 = vmatmul.mubr.f32.vlgmr.msra.gmra.mrb[6].mxu0 %v1279_v22  ;;  %3221 = vmatmul.mubr.f32.vlgmr.msra.gmra.mrb[12].mxu1 %v1279_v22 }
 0x3d3   :  { %3625 = vmatpush1.bf16.msra.mxu0 %v4431_v8  ;;  %3656 = vmatpush3.bf16.msra.mxu1 %v4460_v36 }
 0x3d4   :  { %3627 = vmatprep.subr.bf16.mxu0 %v4433_v9  ;;  %3657 = vmatprep.subr.bf16.mxu1 %v4279_v31 }
 0x3d5   :  { %1638 = vmatprep.mubr.f32.mxu0 %v4278_v0  ;;  %3255 = vmatprep.mubr.msk.f32.mxu1 %vm4280_vm2, %v4278_v0 }
 0x3d7   :  { %3629 = vmatpush1.bf16.msra.mxu0 %v4437_v16  ;;  %3659 = vmatpush3.bf16.msra.mxu1 %v4470_v45 }
 0x3d8   :  { %3631 = vmatprep.subr.bf16.mxu0 %v4441_v18  ;;  %3660 = vmatprep.subr.bf16.mxu1 %v4279_v31 }
 0x3db   :  { %3633 = vmatpush1.bf16.msra.mxu0 %v4447_v24  ;;  %3662 = vmatpush3.bf16.msra.mxu1 %v4482_v54 }
 0x3dc   :  { %3635 = vmatprep.subr.bf16.mxu0 %v4451_v26  ;;  %3663 = vmatprep.subr.bf16.mxu1 %v4279_v31 }
 0x3df   :  { %3637 = vmatpush1.bf16.msra.mxu0 %v4457_v34  ;;  %3665 = vmatpush3.bf16.msra.mxu1 %v4492_v63 }
 0x3e0   :  { %3639 = vmatprep.subr.bf16.mxu0 %v4463_v37  ;;  %3666 = vmatprep.subr.bf16.mxu1 %v4279_v31 }
 0x3e3   :  { %3641 = vmatpush1.bf16.msra.mxu0 %v4467_v43  ;;  %3668 = vmatpush3.bf16.msra.mxu1 %v4502_v7 }
 0x3e4   :  { %3643 = vmatprep.subr.bf16.mxu0 %v4473_v46  ;;  %3669 = vmatprep.subr.bf16.mxu1 %v4279_v31 }
 0x3e7   :  { %3645 = vmatpush1.bf16.msra.mxu0 %v4479_v52  ;;  %3671 = vmatpush3.bf16.msra.mxu1 %v4510_v13 }
 0x3e8   :  { %3647 = vmatprep.subr.bf16.mxu0 %v4485_v55  ;;  %3672 = vmatprep.subr.bf16.mxu1 %v4279_v31 }
 0x3eb   :  { %3649 = vmatpush1.bf16.msra.mxu0 %v4489_v61  ;;  %3674 = vmatpush3.bf16.msra.mxu1 %v4516_v17 }
 0x3ec   :  { %3651 = vmatprep.subr.bf16.mxu0 %v4495_v1  ;;  %3675 = vmatprep.subr.bf16.mxu1 %v4279_v31 }
 0x3ef   :  { %3653 = vmatpush1.bf16.msra.mxu0 %v4499_v6  ;;  %3677 = vmatpush3.bf16.msra.mxu1 %v4523_v21 }
 0x3f0   :  { %3679 = vmatprep.subr.bf16.mxu0 %v4429_v4  ;;  %3710 = vmatprep.subr.bf16.mxu1 %v4279_v31 }
 0x4a5   :  { %v1347_v3 = vpop.f32.mrb[6].mxu0  ;;  %v1418_v5 = vpop.f32.mrb[12].mxu1 }
 0x4a6   :  { %v1429_v23 = vrot.slane %v1347_v3, %v4561_v58  ;;  %v1349_v57 = vpop.f32.mrb[7].mxu0  ;;  %v3222_v25 = vpop.f32.mrb[13].mxu1  ;;  %v1506_v39 = vadd.f32 %v4569_v40, %v1418_v5  ;;  %v1535_v5 = vrot.slane %v1262_v15, 2 }
 0x4a7   :  { %v1474_v27 = vrot.slane %v1349_v57, %v4561_v58  ;;  %v1534_v25 = vrot.slane %v1260_v28, 2 }
 0x4a8   :  { %v1430_v29 = vcombine.high %v1429_v23, %v1429_v23  ;;  %v1437_v30 = vrot.slane %v1429_v23, %v4561_v58  ;;  %v1514_v10 = vrot.slane %v1506_v39, %v4561_v58 }
 0x4a9   :  { %v1475_v32 = vcombine.high %v1474_v27, %v1474_v27  ;;  %v1482_v41 = vrot.slane %v1474_v27, %v4561_v58 }
 0x4aa   :  { %v1444_v33 = vrot.slane %v1430_v29, %v4561_v58  ;;  %v1447_v35 = vadd.f32 %v1437_v30, %v1260_v28  ;;  %v1515_v20 = vcombine.high %v1514_v10, %v1514_v10  ;;  %v1522_v3 = vrot.slane %v1514_v10, %v4561_v58 }
 0x4ab   :  { %v1489_v12 = vrot.slane %v1475_v32, %v4561_v58  ;;  %v1492_v48 = vadd.f32 %v1482_v41, %v1463_v38 }
 0x4ac   :  { %v1448_v44 = vadd.f32 %v1444_v33, %v1262_v15  ;;  %v2899_v42 = vmul.f32 -1.442695, %v1447_v35  ;;  %v1529_v27 = vrot.slane %v1515_v20, %v4561_v58 }
 0x4ad   :  { %v1493_v53 = vadd.f32 %v1489_v12, %v1464_v47  ;;  %v2901_v56 = vmul.f32 -1.442695, %v1492_v48 }
 0x4ae   :  { %3956 = vpow2.f32 %v2899_v42  ;;  %v2900_v51 = vmul.f32 -1.442695, %v1448_v44 }
 0x4af   :  { %v2902_v59 = vmul.f32 -1.442695, %v1493_v53 }
 0x4b0   :  { %3958 = vpow2.f32 %v2900_v51 }
 0x4b1   :  { %3960 = vpow2.f32 %v2901_v56 }
 0x4b2   :  { %3962 = vpow2.f32 %v2902_v59 }
 0x4b8   :  { %v3957_v60 = vpop.eup %3956 }
 0x4b9   :  { %v1455_v49 = vadd.f32 1.0, %v3957_v60 }
 0x4ba   :  { %v3959_v62 = vpop.eup %3958 }
 0x4bb   :  { %v1456_v2 = vadd.f32 1.0, %v3959_v62  ;;  %3964 = vrcp.f32 %v1455_v49  ;;  %v3961_v11 = vpop.eup %3960 }
 0x4bc   :  { %v3963_v19 = vpop.eup %3962  ;;  %v1500_v22 = vadd.f32 1.0, %v3961_v11  ;;  %v1553_v11 = vld [vmem:[#allocation2 + $0x4] ss:$8 sm:$0x7] }
 0x4bd   :  { %3966 = vrcp.f32 %v1456_v2  ;;  %v1501_v23 = vadd.f32 1.0, %v3963_v19 }
 0x4be   :  { %3968 = vrcp.f32 %v1500_v22 }
 0x4bf   :  { %3970 = vrcp.f32 %v1501_v23  ;;  %v1555_v23 = vld [vmem:[#allocation2 + $0x1c] ss:$8 sm:$0x7] }
 0x4c5   :  { %v3965_v57 = vpop.eup %3964 }
 0x4c6   :  { %v1532_v29 = vmul.f32 %v3965_v57, %v1522_v3 }
 0x4c7   :  { %v3967_v30 = vpop.eup %3966 }
 0x4c8   :  { %v1533_v32 = vmul.f32 %v3967_v30, %v1529_v27  ;;  %v1538_v41 = vadd.f32 %v1534_v25, %v1532_v29  ;;  %v3969_v35 = vpop.eup %3968  ;;  %v1756_v27 = vrot.slane %v1553_v11, 1 }
 0x4c9   :  { %v3971_v38 = vpop.eup %3970  ;;  %v1542_v12 = vsub.f32 1.0, %v3969_v35  ;;  %v1546_v28 = vmul.f32 %v3969_v35, %v4693_v14 }
 0x4ca   :  { %v1539_v33 = vadd.f32 %v1535_v5, %v1533_v32  ;;  %3972 = vtanh.f32 %v1538_v41  ;;  %v1543_v42 = vsub.f32 1.0, %v3971_v38  ;;  %v1547_v53 = vmul.f32 %v3971_v38, %v4695_v50 }
 0x4cb   :  { %v1757_v32 = vrot.slane %v1555_v23, 1 }
 0x4cc   :  { %3974 = vtanh.f32 %v1539_v33 }
 0x4d4   :  { %v3973_v44 = vpop.eup %3972 }
 0x4d5   :  { %v1544_v47 = vmul.f32 %v3973_v44, %v1542_v12 }
 0x4d6   :  { %v3975_v48 = vpop.eup %3974 }
 0x4d7   :  { %v1545_v51 = vmul.f32 %v3975_v48, %v1543_v42  ;;  %v4750_v56 = vadd.f32 %v1546_v28, %v1544_v47 }
 0x4d9   :  { %v4752_v15 = vadd.f32 %v1547_v53, %v1545_v51  ;;  %1550 = vst [vmem:[#allocation3 + $0x3] sm:$0x1] %v4750_v56 }
 0x4db   :  { %1551 = vst [vmem:[#allocation3 + $0xb] sm:$0x1] %v4752_v15  ;;  %v1558_v59 = vcombine.low %v4750_v56, %v4752_v15 }
 0x4dd   :  { %v1565_v60 = vrot.slane %v1558_v59, %v4561_v58 }
 0x4df   :  { %v1572_v49 = vrot.slane %v1565_v60, %v4561_v58 }
 0x4e1   :  { %1639 = vmatmul.mubr.f32.vlgmr.msra.gmra.mrb[8].mxu0 %v1572_v49  ;;  %3256 = vmatmul.mubr.f32.vlgmr.msra.gmra.mrb[14].mxu1 %v1572_v49 }
 0x4e2   :  { %3681 = vmatpush1.bf16.msra.mxu0 %v4431_v8  ;;  %3712 = vmatpush3.bf16.msra.mxu1 %v4460_v36 }
 0x4e3   :  { %3683 = vmatprep.subr.bf16.mxu0 %v4433_v9  ;;  %3713 = vmatprep.subr.bf16.mxu1 %v4279_v31 }
 0x4e4   :  { %1931 = vmatprep.mubr.f32.mxu0 %v4278_v0  ;;  %3290 = vmatprep.mubr.msk.f32.mxu1 %vm4280_vm2, %v4278_v0 }
 0x4e6   :  { %3685 = vmatpush1.bf16.msra.mxu0 %v4437_v16  ;;  %3715 = vmatpush3.bf16.msra.mxu1 %v4470_v45 }
 0x4e7   :  { %3687 = vmatprep.subr.bf16.mxu0 %v4441_v18  ;;  %3716 = vmatprep.subr.bf16.mxu1 %v4279_v31 }
 0x4ea   :  { %3689 = vmatpush1.bf16.msra.mxu0 %v4447_v24  ;;  %3718 = vmatpush3.bf16.msra.mxu1 %v4482_v54 }
 0x4eb   :  { %3691 = vmatprep.subr.bf16.mxu0 %v4451_v26  ;;  %3719 = vmatprep.subr.bf16.mxu1 %v4279_v31 }
 0x4ee   :  { %3693 = vmatpush1.bf16.msra.mxu0 %v4457_v34  ;;  %3721 = vmatpush3.bf16.msra.mxu1 %v4492_v63 }
 0x4ef   :  { %3695 = vmatprep.subr.bf16.mxu0 %v4463_v37  ;;  %3722 = vmatprep.subr.bf16.mxu1 %v4279_v31 }
 0x4f2   :  { %3697 = vmatpush1.bf16.msra.mxu0 %v4467_v43  ;;  %3724 = vmatpush3.bf16.msra.mxu1 %v4502_v7 }
 0x4f3   :  { %3699 = vmatprep.subr.bf16.mxu0 %v4473_v46  ;;  %3725 = vmatprep.subr.bf16.mxu1 %v4279_v31 }
 0x4f6   :  { %3701 = vmatpush1.bf16.msra.mxu0 %v4479_v52  ;;  %3727 = vmatpush3.bf16.msra.mxu1 %v4510_v13 }
 0x4f7   :  { %3703 = vmatprep.subr.bf16.mxu0 %v4485_v55  ;;  %3728 = vmatprep.subr.bf16.mxu1 %v4279_v31 }
 0x4fa   :  { %3705 = vmatpush1.bf16.msra.mxu0 %v4489_v61  ;;  %3730 = vmatpush3.bf16.msra.mxu1 %v4516_v17 }
 0x4fb   :  { %3707 = vmatprep.subr.bf16.mxu0 %v4495_v1  ;;  %3731 = vmatprep.subr.bf16.mxu1 %v4279_v31 }
 0x4fe   :  { %3709 = vmatpush1.bf16.msra.mxu0 %v4499_v6  ;;  %3733 = vmatpush3.bf16.msra.mxu1 %v4523_v21 }
 0x4ff   :  { %3735 = vmatprep.subr.bf16.mxu0 %v4429_v4  ;;  %3766 = vmatprep.subr.bf16.mxu1 %v4279_v31 }
 0x5b4   :  { %v1640_v14 = vpop.f32.mrb[8].mxu0  ;;  %v1711_v50 = vpop.f32.mrb[14].mxu1 }
 0x5b5   :  { %v1722_v62 = vrot.slane %v1640_v14, %v4561_v58  ;;  %v1642_v39 = vpop.f32.mrb[9].mxu0  ;;  %v3257_v2 = vpop.f32.mrb[15].mxu1  ;;  %v1799_v28 = vadd.f32 %v4569_v40, %v1711_v50  ;;  %v1828_v40 = vrot.slane %v1555_v23, 2 }
 0x5b6   :  { %v1767_v10 = vrot.slane %v1642_v39, %v4561_v58  ;;  %v1827_v2 = vrot.slane %v1553_v11, 2 }
 0x5b7   :  { %v1723_v19 = vcombine.high %v1722_v62, %v1722_v62  ;;  %v1730_v20 = vrot.slane %v1722_v62, %v4561_v58  ;;  %v1807_v51 = vrot.slane %v1799_v28, %v4561_v58 }
 0x5b8   :  { %v1768_v22 = vcombine.high %v1767_v10, %v1767_v10  ;;  %v1775_v3 = vrot.slane %v1767_v10, %v4561_v58 }
 0x5b9   :  { %v1737_v57 = vrot.slane %v1723_v19, %v4561_v58  ;;  %v1740_v25 = vadd.f32 %v1730_v20, %v1553_v11  ;;  %v1808_v60 = vcombine.high %v1807_v51, %v1807_v51  ;;  %v1815_v14 = vrot.slane %v1807_v51, %v4561_v58  ;;  %v1846_v51 = vld [vmem:[#allocation2 + $0x5] ss:$8 sm:$0x7] }
 0x5ba   :  { %v1782_v29 = vrot.slane %v1768_v22, %v4561_v58  ;;  %v1785_v41 = vadd.f32 %v1775_v3, %v1756_v27 }
 0x5bb   :  { %v1741_v30 = vadd.f32 %v1737_v57, %v1555_v23  ;;  %v2903_v5 = vmul.f32 -1.442695, %v1740_v25  ;;  %v1822_v10 = vrot.slane %v1808_v60, %v4561_v58 }
 0x5bc   :  { %v1786_v35 = vadd.f32 %v1782_v29, %v1757_v32  ;;  %v2905_v38 = vmul.f32 -1.442695, %v1785_v41 }
 0x5bd   :  { %3976 = vpow2.f32 %v2903_v5  ;;  %v2904_v33 = vmul.f32 -1.442695, %v1741_v30 }
 0x5be   :  { %v2906_v12 = vmul.f32 -1.442695, %v1786_v35 }
 0x5bf   :  { %3978 = vpow2.f32 %v2904_v33 }
 0x5c0   :  { %3980 = vpow2.f32 %v2905_v38 }
 0x5c1   :  { %3982 = vpow2.f32 %v2906_v12 }
 0x5c7   :  { %v3977_v44 = vpop.eup %3976 }
 0x5c8   :  { %v1748_v42 = vadd.f32 1.0, %v3977_v44 }
 0x5c9   :  { %v3979_v47 = vpop.eup %3978 }
 0x5ca   :  { %v1749_v48 = vadd.f32 1.0, %v3979_v47  ;;  %3984 = vrcp.f32 %v1748_v42  ;;  %v3981_v53 = vpop.eup %3980 }
 0x5cb   :  { %v3983_v59 = vpop.eup %3982  ;;  %v1793_v49 = vadd.f32 1.0, %v3981_v53 }
 0x5cc   :  { %3986 = vrcp.f32 %v1749_v48  ;;  %v1794_v62 = vadd.f32 1.0, %v3983_v59 }
 0x5cd   :  { %3988 = vrcp.f32 %v1793_v49 }
 0x5ce   :  { %3990 = vrcp.f32 %v1794_v62 }
 0x5d4   :  { %v3985_v39 = vpop.eup %3984 }
 0x5d5   :  { %v1825_v19 = vmul.f32 %v3985_v39, %v1815_v14  ;;  %v1848_v14 = vld [vmem:[#allocation2 + $0x1d] ss:$8 sm:$0x7]  ;;  %v2049_v39 = vrot.slane %v1846_v51, 1 }
 0x5d6   :  { %v3987_v20 = vpop.eup %3986 }
 0x5d7   :  { %v1826_v50 = vmul.f32 %v3987_v20, %v1822_v10  ;;  %v1831_v22 = vadd.f32 %v1827_v2, %v1825_v19  ;;  %v3989_v57 = vpop.eup %3988  ;;  %v2050_v20 = vrot.slane %v1848_v14, 1 }
 0x5d8   :  { %v3991_v25 = vpop.eup %3990  ;;  %v1835_v27 = vsub.f32 1.0, %v3989_v57  ;;  %v1839_v11 = vmul.f32 %v3989_v57, %v4750_v56 }
 0x5d9   :  { %v1832_v3 = vadd.f32 %v1828_v40, %v1826_v50  ;;  %3992 = vtanh.f32 %v1831_v22  ;;  %v1836_v30 = vsub.f32 1.0, %v3991_v25  ;;  %v1840_v33 = vmul.f32 %v3991_v25, %v4752_v15 }
 0x5db   :  { %3994 = vtanh.f32 %v1832_v3 }
 0x5e3   :  { %v3993_v29 = vpop.eup %3992 }
 0x5e4   :  { %v1837_v5 = vmul.f32 %v3993_v29, %v1835_v27 }
 0x5e5   :  { %v3995_v32 = vpop.eup %3994 }
 0x5e6   :  { %v1838_v41 = vmul.f32 %v3995_v32, %v1836_v30  ;;  %v4807_v35 = vadd.f32 %v1839_v11, %v1837_v5  ;;  %v4858_v30 = vld [vmem:[#allocation12] ss:$0 sm:$0xff] }
 0x5e8   :  { %v4809_v23 = vadd.f32 %v1840_v33, %v1838_v41  ;;  %1843 = vst [vmem:[#allocation3 + $0x4] sm:$0x1] %v4807_v35 }
 0x5ea   :  { %1844 = vst [vmem:[#allocation3 + $0xc] sm:$0x1] %v4809_v23  ;;  %v1851_v38 = vcombine.low %v4807_v35, %v4809_v23 }
 0x5ec   :  { %v1858_v12 = vrot.slane %v1851_v38, %v4561_v58 }
 0x5ee   :  { %v1865_v44 = vrot.slane %v1858_v12, %v4561_v58 }
 0x5f0   :  { %1932 = vmatmul.mubr.f32.vlgmr.msra.gmra.mrb[10].mxu0 %v1865_v44  ;;  %3291 = vmatmul.mubr.f32.vlgmr.msra.gmra.mrb[16].mxu1 %v1865_v44 }
 0x5f1   :  { %3737 = vmatpush1.bf16.msra.mxu0 %v4431_v8  ;;  %3768 = vmatpush3.bf16.msra.mxu1 %v4460_v36 }
 0x5f2   :  { %3739 = vmatprep.subr.bf16.mxu0 %v4433_v9  ;;  %3769 = vmatprep.subr.bf16.mxu1 %v4279_v31 }
 0x5f3   :  { %2224 = vmatprep.mubr.f32.mxu0 %v4278_v0  ;;  %3325 = vmatprep.mubr.msk.f32.mxu1 %vm4280_vm2, %v4278_v0 }
 0x5f5   :  { %3741 = vmatpush1.bf16.msra.mxu0 %v4437_v16  ;;  %3771 = vmatpush3.bf16.msra.mxu1 %v4470_v45 }
 0x5f6   :  { %3743 = vmatprep.subr.bf16.mxu0 %v4441_v18  ;;  %3772 = vmatprep.subr.bf16.mxu1 %v4279_v31 }
 0x5f9   :  { %3745 = vmatpush1.bf16.msra.mxu0 %v4447_v24  ;;  %3774 = vmatpush3.bf16.msra.mxu1 %v4482_v54 }
 0x5fa   :  { %3747 = vmatprep.subr.bf16.mxu0 %v4451_v26  ;;  %3775 = vmatprep.subr.bf16.mxu1 %v4279_v31 }
 0x5fd   :  { %3749 = vmatpush1.bf16.msra.mxu0 %v4457_v34  ;;  %3777 = vmatpush3.bf16.msra.mxu1 %v4492_v63 }
 0x5fe   :  { %3751 = vmatprep.subr.bf16.mxu0 %v4463_v37  ;;  %3778 = vmatprep.subr.bf16.mxu1 %v4279_v31 }
 0x601   :  { %3753 = vmatpush1.bf16.msra.mxu0 %v4467_v43  ;;  %3780 = vmatpush3.bf16.msra.mxu1 %v4502_v7 }
 0x602   :  { %3755 = vmatprep.subr.bf16.mxu0 %v4473_v46  ;;  %3781 = vmatprep.subr.bf16.mxu1 %v4279_v31 }
 0x605   :  { %3757 = vmatpush1.bf16.msra.mxu0 %v4479_v52  ;;  %3783 = vmatpush3.bf16.msra.mxu1 %v4510_v13 }
 0x606   :  { %3759 = vmatprep.subr.bf16.mxu0 %v4485_v55  ;;  %3784 = vmatprep.subr.bf16.mxu1 %v4279_v31 }
 0x609   :  { %3761 = vmatpush1.bf16.msra.mxu0 %v4489_v61  ;;  %3786 = vmatpush3.bf16.msra.mxu1 %v4516_v17 }
 0x60a   :  { %3763 = vmatprep.subr.bf16.mxu0 %v4495_v1  ;;  %3787 = vmatprep.subr.bf16.mxu1 %v4279_v31 }
 0x60d   :  { %3765 = vmatpush1.bf16.msra.mxu0 %v4499_v6  ;;  %3789 = vmatpush3.bf16.msra.mxu1 %v4523_v21 }
 0x60e   :  { %3791 = vmatprep.subr.bf16.mxu0 %v4429_v4  ;;  %3822 = vmatprep.subr.bf16.mxu1 %v4279_v31 }
 0x6c3   :  { %v1933_v56 = vpop.f32.mrb[10].mxu0  ;;  %v2004_v15 = vpop.f32.mrb[16].mxu1 }
 0x6c4   :  { %v2015_v42 = vrot.slane %v1933_v56, %v4561_v58  ;;  %v1935_v47 = vpop.f32.mrb[11].mxu0  ;;  %v3292_v28 = vpop.f32.mrb[17].mxu1  ;;  %v2092_v5 = vadd.f32 %v4858_v30, %v2004_v15  ;;  %v2121_v15 = vrot.slane %v1848_v14, 2 }
 0x6c5   :  { %v2060_v48 = vrot.slane %v1935_v47, %v4561_v58  ;;  %v2120_v47 = vrot.slane %v1846_v51, 2 }
 0x6c6   :  { %v2016_v53 = vcombine.high %v2015_v42, %v2015_v42  ;;  %v2023_v59 = vrot.slane %v2015_v42, %v4561_v58  ;;  %v2100_v32 = vrot.slane %v2092_v5, %v4561_v58 }
 0x6c7   :  { %v2061_v60 = vcombine.high %v2060_v48, %v2060_v48  ;;  %v2068_v49 = vrot.slane %v2060_v48, %v4561_v58 }
 0x6c8   :  { %v2030_v4 = vrot.slane %v2016_v53, %v4561_v58  ;;  %v2033_v62 = vadd.f32 %v2023_v59, %v1846_v51  ;;  %v2101_v38 = vcombine.high %v2100_v32, %v2100_v32  ;;  %v2108_v44 = vrot.slane %v2100_v32, %v4561_v58 }
 0x6c9   :  { %v2075_v2 = vrot.slane %v2061_v60, %v4561_v58  ;;  %v2078_v40 = vadd.f32 %v2068_v49, %v2049_v39 }
 0x6ca   :  { %v2034_v10 = vadd.f32 %v2030_v4, %v1848_v14  ;;  %v2907_v19 = vmul.f32 -1.442695, %v2033_v62  ;;  %v2115_v28 = vrot.slane %v2101_v38, %v4561_v58 }
 0x6cb   :  { %v2079_v22 = vadd.f32 %v2075_v2, %v2050_v20  ;;  %v2909_v3 = vmul.f32 -1.442695, %v2078_v40 }
 0x6cc   :  { %3996 = vpow2.f32 %v2907_v19  ;;  %v2908_v50 = vmul.f32 -1.442695, %v2034_v10 }
 0x6cd   :  { %v2910_v57 = vmul.f32 -1.442695, %v2079_v22 }
 0x6ce   :  { %3998 = vpow2.f32 %v2908_v50 }
 0x6cf   :  { %4000 = vpow2.f32 %v2909_v3 }
 0x6d0   :  { %4002 = vpow2.f32 %v2910_v57 }
 0x6d6   :  { %v3997_v25 = vpop.eup %3996 }
 0x6d7   :  { %v2041_v27 = vadd.f32 1.0, %v3997_v25 }
 0x6d8   :  { %v3999_v29 = vpop.eup %3998 }
 0x6d9   :  { %v2042_v11 = vadd.f32 1.0, %v3999_v29  ;;  %4004 = vrcp.f32 %v2041_v27  ;;  %v4001_v41 = vpop.eup %4000 }
 0x6da   :  { %v4003_v33 = vpop.eup %4002  ;;  %v2086_v12 = vadd.f32 1.0, %v4001_v41 }
 0x6db   :  { %4006 = vrcp.f32 %v2042_v11  ;;  %v2087_v56 = vadd.f32 1.0, %v4003_v33 }
 0x6dc   :  { %4008 = vrcp.f32 %v2086_v12 }
 0x6dd   :  { %4010 = vrcp.f32 %v2087_v56 }
 0x6e3   :  { %v4005_v42 = vpop.eup %4004 }
 0x6e4   :  { %v2118_v48 = vmul.f32 %v4005_v42, %v2108_v44 }
 0x6e5   :  { %v4007_v53 = vpop.eup %4006 }
 0x6e6   :  { %v2119_v59 = vmul.f32 %v4007_v53, %v2115_v28  ;;  %v2124_v60 = vadd.f32 %v2120_v47, %v2118_v48  ;;  %v4009_v4 = vpop.eup %4008 }
 0x6e7   :  { %v4011_v62 = vpop.eup %4010  ;;  %v2128_v39 = vsub.f32 1.0, %v4009_v4  ;;  %v2132_v51 = vmul.f32 %v4009_v4, %v4807_v35 }
 0x6e8   :  { %v2125_v49 = vadd.f32 %v2121_v15, %v2119_v59  ;;  %4012 = vtanh.f32 %v2124_v60  ;;  %v2129_v10 = vsub.f32 1.0, %v4011_v62  ;;  %v2133_v50 = vmul.f32 %v4011_v62, %v4809_v23 }
 0x6ea   :  { %4014 = vtanh.f32 %v2125_v49 }
 0x6f2   :  { %v4013_v2 = vpop.eup %4012 }
 0x6f3   :  { %v2130_v19 = vmul.f32 %v4013_v2, %v2128_v39 }
 0x6f4   :  { %v4015_v20 = vpop.eup %4014 }
 0x6f5   :  { %v2131_v40 = vmul.f32 %v4015_v20, %v2129_v10  ;;  %v4866_v22 = vadd.f32 %v2132_v51, %v2130_v19 }
 0x6f7   :  { %v4868_v14 = vadd.f32 %v2133_v50, %v2131_v40  ;;  %2136 = vst [vmem:[#allocation3 + $0x5] sm:$0x1] %v4866_v22 }
 0x6f9   :  { %2137 = vst [vmem:[#allocation3 + $0xd] sm:$0x1] %v4868_v14  ;;  %v2144_v3 = vcombine.low %v4866_v22, %v4868_v14 }
 0x6fb   :  { %v2151_v57 = vrot.slane %v2144_v3, %v4561_v58 }
 0x6fd   :  { %v2158_v25 = vrot.slane %v2151_v57, %v4561_v58 }
 0x6ff   :  { %2225 = vmatmul.mubr.f32.vlgmr.msra.gmra.mrb[12].mxu0 %v2158_v25  ;;  %3326 = vmatmul.mubr.f32.vlgmr.msra.gmra.mrb[18].mxu1 %v2158_v25 }
 0x700   :  { %3793 = vmatpush1.bf16.msra.mxu0 %v4431_v8  ;;  %3824 = vmatpush3.bf16.msra.mxu1 %v4460_v36 }
 0x701   :  { %3795 = vmatprep.subr.bf16.mxu0 %v4433_v9  ;;  %3825 = vmatprep.subr.bf16.mxu1 %v4279_v31 }
 0x702   :  { %2517 = vmatprep.mubr.f32.mxu0 %v4278_v0  ;;  %3360 = vmatprep.mubr.msk.f32.mxu1 %vm4280_vm2, %v4278_v0 }
 0x704   :  { %3797 = vmatpush1.bf16.msra.mxu0 %v4437_v16  ;;  %3827 = vmatpush3.bf16.msra.mxu1 %v4470_v45 }
 0x705   :  { %3799 = vmatprep.subr.bf16.mxu0 %v4441_v18  ;;  %3828 = vmatprep.subr.bf16.mxu1 %v4279_v31 }
 0x708   :  { %3801 = vmatpush1.bf16.msra.mxu0 %v4447_v24  ;;  %3830 = vmatpush3.bf16.msra.mxu1 %v4482_v54 }
 0x709   :  { %3803 = vmatprep.subr.bf16.mxu0 %v4451_v26  ;;  %3831 = vmatprep.subr.bf16.mxu1 %v4279_v31  ;;  %v2139_v26 = vld [vmem:[#allocation2 + $0x6] ss:$8 sm:$0x7] }
 0x70a   :  { %v2413_v56 = vrot.slane %v2139_v26, 2 }
 0x70c   :  { %3805 = vmatpush1.bf16.msra.mxu0 %v4457_v34  ;;  %3833 = vmatpush3.bf16.msra.mxu1 %v4492_v63 }
 0x70d   :  { %3807 = vmatprep.subr.bf16.mxu0 %v4463_v37  ;;  %3834 = vmatprep.subr.bf16.mxu1 %v4279_v31 }
 0x710   :  { %3809 = vmatpush1.bf16.msra.mxu0 %v4467_v43  ;;  %3836 = vmatpush3.bf16.msra.mxu1 %v4502_v7 }
 0x711   :  { %3811 = vmatprep.subr.bf16.mxu0 %v4473_v46  ;;  %3837 = vmatprep.subr.bf16.mxu1 %v4279_v31 }
 0x714   :  { %3813 = vmatpush1.bf16.msra.mxu0 %v4479_v52  ;;  %3839 = vmatpush3.bf16.msra.mxu1 %v4510_v13  ;;  %v2342_v52 = vrot.slane %v2139_v26, 1 }
 0x715   :  { %3815 = vmatprep.subr.bf16.mxu0 %v4485_v55  ;;  %3840 = vmatprep.subr.bf16.mxu1 %v4279_v31 }
 0x718   :  { %3817 = vmatpush1.bf16.msra.mxu0 %v4489_v61  ;;  %3842 = vmatpush3.bf16.msra.mxu1 %v4516_v17 }
 0x719   :  { %3819 = vmatprep.subr.bf16.mxu0 %v4495_v1  ;;  %3843 = vmatprep.subr.bf16.mxu1 %v4279_v31  ;;  %v2141_v31 = vld [vmem:[#allocation2 + $0x1e] ss:$8 sm:$0x7] }
 0x71a   :  { %v2343_v63 = vrot.slane %v2141_v31, 1  ;;  %v2414_v48 = vrot.slane %v2141_v31, 2 }
 0x71c   :  { %3821 = vmatpush1.bf16.msra.mxu0 %v4499_v6  ;;  %3845 = vmatpush3.bf16.msra.mxu1 %v4523_v21 }
 0x7d2   :  { %v2226_v0 = vpop.f32.mrb[12].mxu0  ;;  %v2297_v8 = vpop.f32.mrb[18].mxu1 }
 0x7d3   :  { %v2308_v9 = vrot.slane %v2226_v0, %v4561_v58  ;;  %v2228_v16 = vpop.f32.mrb[13].mxu0  ;;  %v3327_v18 = vpop.f32.mrb[19].mxu1  ;;  %v2385_v27 = vadd.f32 %v4858_v30, %v2297_v8  ;;  %v2746_v0 = vld [vmem:[#allocation13 + $0x8] sm:$0xff]  ;;  %v2747_v8 = vld [vmem:[#allocation13 + $0x10] sm:$0xff] }
 0x7d4   :  { %v2353_v24 = vrot.slane %v2228_v16, %v4561_v58  ;;  %v2749_v18 = vld [vmem:[#allocation13 + $0x20] sm:$0xff] }
 0x7d5   :  { %v2309_v34 = vcombine.high %v2308_v9, %v2308_v9  ;;  %v2316_v36 = vrot.slane %v2308_v9, %v4561_v58  ;;  %v2393_v5 = vrot.slane %v2385_v27, %v4561_v58  ;;  %v2748_v9 = vld [vmem:[#allocation13 + $0x18] sm:$0xff] }
 0x7d6   :  { %v2354_v37 = vcombine.high %v2353_v24, %v2353_v24  ;;  %v2361_v43 = vrot.slane %v2353_v24, %v4561_v58  ;;  %v3850_v16 = vpack.c.bf16 %v2748_v9, %v2747_v8  ;;  %v2750_v24 = vld [vmem:[#allocation13 + $0x28] sm:$0xff] }
 0x7d7   :  { %v2323_v45 = vrot.slane %v2309_v34, %v4561_v58  ;;  %v2326_v46 = vadd.f32 %v2316_v36, %v2139_v26  ;;  %v2394_v41 = vcombine.high %v2393_v5, %v2393_v5  ;;  %v2401_v38 = vrot.slane %v2393_v5, %v4561_v58  ;;  %v2751_v34 = vld [vmem:[#allocation13 + $0x30] sm:$0xff]  ;;  %v2752_v36 = vld [vmem:[#allocation13 + $0x38] sm:$0xff] }
 0x7d8   :  { %v2368_v54 = vrot.slane %v2354_v37, %v4561_v58  ;;  %v2371_v1 = vadd.f32 %v2361_v43, %v2342_v52  ;;  %v3854_v26 = vpack.c.bf16 %v2750_v24, %v2749_v18  ;;  %v3858_v37 = vpack.c.bf16 %v2752_v36, %v2751_v34  ;;  %v2753_v43 = vld [vmem:[#allocation13 + $0x40] sm:$0xff]  ;;  %v2756_v52 = vld [vmem:[#allocation13 + $0x58] sm:$0xff] }
 0x7d9   :  { %v2327_v55 = vadd.f32 %v2323_v45, %v2141_v31  ;;  %v2911_v61 = vmul.f32 -1.442695, %v2326_v46  ;;  %v2408_v42 = vrot.slane %v2394_v41, %v4561_v58  ;;  %v2754_v31 = vld [vmem:[#allocation13 + $0x48] sm:$0xff]  ;;  %v2755_v46 = vld [vmem:[#allocation13 + $0x50] sm:$0xff] }
 0x7da   :  { %v2372_v7 = vadd.f32 %v2368_v54, %v2343_v63  ;;  %v2913_v13 = vmul.f32 -1.442695, %v2371_v1  ;;  %v3862_v45 = vpack.c.bf16 %v2754_v31, %v2753_v43  ;;  %v3866_v54 = vpack.c.bf16 %v2756_v52, %v2755_v46  ;;  %v2759_v1 = vld [vmem:[#allocation13 + $0x70] sm:$0xff] }
 0x7db   :  { %4016 = vpow2.f32 %v2911_v61  ;;  %v2912_v6 = vmul.f32 -1.442695, %v2327_v55  ;;  %v2757_v55 = vld [vmem:[#allocation13 + $0x60] sm:$0xff]  ;;  %v2758_v61 = vld [vmem:[#allocation13 + $0x68] sm:$0xff] }
 0x7dc   :  { %v2914_v17 = vmul.f32 -1.442695, %v2372_v7  ;;  %v3870_v63 = vpack.c.bf16 %v2758_v61, %v2757_v55 }
 0x7dd   :  { %4018 = vpow2.f32 %v2912_v6  ;;  %v2760_v6 = vld [vmem:[#allocation13 + $0x78] sm:$0xff] }
 0x7de   :  { %4020 = vpow2.f32 %v2913_v13  ;;  %v3874_v7 = vpack.c.bf16 %v2760_v6, %v2759_v1 }
 0x7df   :  { %4022 = vpow2.f32 %v2914_v17 }
 0x7e5   :  { %v4017_v21 = vpop.eup %4016 }
 0x7e6   :  { %v2334_v35 = vadd.f32 1.0, %v4017_v21 }
 0x7e7   :  { %v4019_v23 = vpop.eup %4018 }
 0x7e8   :  { %v2335_v29 = vadd.f32 1.0, %v4019_v23  ;;  %4024 = vrcp.f32 %v2334_v35  ;;  %v4021_v11 = vpop.eup %4020 }
 0x7e9   :  { %v4023_v32 = vpop.eup %4022  ;;  %v2379_v33 = vadd.f32 1.0, %v4021_v11 }
 0x7ea   :  { %4026 = vrcp.f32 %v2335_v29  ;;  %v2380_v12 = vadd.f32 1.0, %v4023_v32  ;;  %v2432_v29 = vld [vmem:[#allocation2 + $0x7] ss:$8 sm:$0x7] }
 0x7eb   :  { %4028 = vrcp.f32 %v2379_v33  ;;  %v2434_v33 = vld [vmem:[#allocation2 + $0x1f] ss:$8 sm:$0x7] }
 0x7ec   :  { %4030 = vrcp.f32 %v2380_v12 }
 0x7f2   :  { %v4025_v44 = vpop.eup %4024 }
 0x7f3   :  { %v2411_v47 = vmul.f32 %v4025_v44, %v2401_v38  ;;  %v2635_v44 = vrot.slane %v2432_v29, 1 }
 0x7f4   :  { %v4027_v28 = vpop.eup %4026 }
 0x7f5   :  { %v2412_v53 = vmul.f32 %v4027_v28, %v2408_v42  ;;  %v2417_v15 = vadd.f32 %v2413_v56, %v2411_v47  ;;  %v4029_v60 = vpop.eup %4028  ;;  %v2636_v28 = vrot.slane %v2434_v33, 1 }
 0x7f6   :  { %v4031_v49 = vpop.eup %4030  ;;  %v2421_v4 = vsub.f32 1.0, %v4029_v60  ;;  %v2425_v10 = vmul.f32 %v4029_v60, %v4866_v22  ;;  %v2745_v22 = vld [vmem:[#allocation13] sm:$0xff] }
 0x7f7   :  { %v2418_v59 = vadd.f32 %v2414_v48, %v2412_v53  ;;  %4032 = vtanh.f32 %v2417_v15  ;;  %v2422_v39 = vsub.f32 1.0, %v4031_v49  ;;  %v2426_v20 = vmul.f32 %v4031_v49, %v4868_v14 }
 0x7f8   :  { %v3846_v14 = vpack.c.bf16 %v2746_v0, %v2745_v22  ;;  %v2706_v0 = vrot.slane %v2432_v29, 2 }
 0x7f9   :  { %4034 = vtanh.f32 %v2418_v59 }
 0x7fa   :  { %3847 = vmatprep.subr.bf16.mxu0 %v3846_v14 }
 0x801   :  { %v4033_v62 = vpop.eup %4032 }
 0x802   :  { %v2423_v2 = vmul.f32 %v4033_v62, %v2421_v4 }
 0x803   :  { %v4035_v19 = vpop.eup %4034 }
 0x804   :  { %v2424_v51 = vmul.f32 %v4035_v19, %v2422_v39  ;;  %v4921_v40 = vadd.f32 %v2425_v10, %v2423_v2 }
 0x806   :  { %v4923_v50 = vadd.f32 %v2426_v20, %v2424_v51  ;;  %2429 = vst [vmem:[#allocation3 + $0x6] sm:$0x1] %v4921_v40 }
 0x808   :  { %2430 = vst [vmem:[#allocation3 + $0xe] sm:$0x1] %v4923_v50  ;;  %v2437_v3 = vcombine.low %v4921_v40, %v4923_v50 }
 0x80a   :  { %v2444_v57 = vrot.slane %v2437_v3, %v4561_v58 }
 0x80c   :  { %v2451_v25 = vrot.slane %v2444_v57, %v4561_v58 }
 0x80e   :  { %2518 = vmatmul.mubr.f32.vlgmr.msra.gmra.mrb[14].mxu0 %v2451_v25  ;;  %3361 = vmatmul.mubr.f32.vlgmr.msra.gmra.mrb[20].mxu1 %v2451_v25 }
 0x80f   :  { %3849 = vmatpush3.bf16.msra.mxu0 %v3846_v14 }
 0x810   :  { %3851 = vmatprep.subr.bf16.mxu0 %v3850_v16 }
 0x813   :  { %3853 = vmatpush3.bf16.msra.mxu0 %v3850_v16 }
 0x814   :  { %3855 = vmatprep.subr.bf16.mxu0 %v3854_v26 }
 0x817   :  { %3857 = vmatpush3.bf16.msra.mxu0 %v3854_v26 }
 0x818   :  { %3859 = vmatprep.subr.bf16.mxu0 %v3858_v37 }
 0x81b   :  { %3861 = vmatpush3.bf16.msra.mxu0 %v3858_v37 }
 0x81c   :  { %3863 = vmatprep.subr.bf16.mxu0 %v3862_v45 }
 0x81f   :  { %3865 = vmatpush3.bf16.msra.mxu0 %v3862_v45 }
 0x820   :  { %3867 = vmatprep.subr.bf16.mxu0 %v3866_v54 }
 0x823   :  { %3869 = vmatpush3.bf16.msra.mxu0 %v3866_v54 }
 0x824   :  { %3871 = vmatprep.subr.bf16.mxu0 %v3870_v63 }
 0x827   :  { %3873 = vmatpush3.bf16.msra.mxu0 %v3870_v63 }
 0x828   :  { %3875 = vmatprep.subr.bf16.mxu0 %v3874_v7 }
 0x82b   :  { %3877 = vmatpush3.bf16.msra.mxu0 %v3874_v7 }
 0x8e1   :  { %v2519_v13 = vpop.f32.mrb[14].mxu0  ;;  %v2590_v17 = vpop.f32.mrb[20].mxu1 }
 0x8e2   :  { %v2601_v21 = vrot.slane %v2519_v13, %v4561_v58  ;;  %v2521_v35 = vpop.f32.mrb[15].mxu0  ;;  %v3362_v23 = vpop.f32.mrb[21].mxu1  ;;  %v2678_v39 = vadd.f32 %v4858_v30, %v2590_v17  ;;  %v2707_v30 = vrot.slane %v2434_v33, 2 }
 0x8e3   :  { %v2646_v27 = vrot.slane %v2521_v35, %v4561_v58 }
 0x8e4   :  { %v2602_v5 = vcombine.high %v2601_v21, %v2601_v21  ;;  %v2609_v11 = vrot.slane %v2601_v21, %v4561_v58  ;;  %v2686_v10 = vrot.slane %v2678_v39, %v4561_v58 }
 0x8e5   :  { %v2647_v32 = vcombine.high %v2646_v27, %v2646_v27  ;;  %v2654_v41 = vrot.slane %v2646_v27, %v4561_v58 }
 0x8e6   :  { %v2616_v38 = vrot.slane %v2602_v5, %v4561_v58  ;;  %v2619_v12 = vadd.f32 %v2609_v11, %v2432_v29  ;;  %v2687_v20 = vcombine.high %v2686_v10, %v2686_v10  ;;  %v2694_v57 = vrot.slane %v2686_v10, %v4561_v58 }
 0x8e7   :  { %v2661_v56 = vrot.slane %v2647_v32, %v4561_v58  ;;  %v2664_v48 = vadd.f32 %v2654_v41, %v2635_v44 }
 0x8e8   :  { %v2620_v42 = vadd.f32 %v2616_v38, %v2434_v33  ;;  %v2915_v47 = vmul.f32 -1.442695, %v2619_v12  ;;  %v2701_v14 = vrot.slane %v2687_v20, %v4561_v58 }
 0x8e9   :  { %v2665_v15 = vadd.f32 %v2661_v56, %v2636_v28  ;;  %v2917_v59 = vmul.f32 -1.442695, %v2664_v48 }
 0x8ea   :  { %4036 = vpow2.f32 %v2915_v47  ;;  %v2916_v53 = vmul.f32 -1.442695, %v2620_v42 }
 0x8eb   :  { %v2918_v60 = vmul.f32 -1.442695, %v2665_v15 }
 0x8ec   :  { %4038 = vpow2.f32 %v2916_v53 }
 0x8ed   :  { %4040 = vpow2.f32 %v2917_v59 }
 0x8ee   :  { %4042 = vpow2.f32 %v2918_v60 }
 0x8f4   :  { %v4037_v49 = vpop.eup %4036 }
 0x8f5   :  { %v2627_v4 = vadd.f32 1.0, %v4037_v49 }
 0x8f6   :  { %v4039_v62 = vpop.eup %4038 }
 0x8f7   :  { %v2628_v2 = vadd.f32 1.0, %v4039_v62  ;;  %4044 = vrcp.f32 %v2627_v4  ;;  %v4041_v19 = vpop.eup %4040 }
 0x8f8   :  { %v4043_v51 = vpop.eup %4042  ;;  %v2672_v3 = vadd.f32 1.0, %v4041_v19 }
 0x8f9   :  { %4046 = vrcp.f32 %v2628_v2  ;;  %v2673_v25 = vadd.f32 1.0, %v4043_v51 }
 0x8fa   :  { %4048 = vrcp.f32 %v2672_v3 }
 0x8fb   :  { %4050 = vrcp.f32 %v2673_v25 }
 0x901   :  { %v4045_v22 = vpop.eup %4044 }
 0x902   :  { %v2704_v8 = vmul.f32 %v4045_v22, %v2694_v57 }
 0x903   :  { %v4047_v9 = vpop.eup %4046 }
 0x904   :  { %v2705_v16 = vmul.f32 %v4047_v9, %v2701_v14  ;;  %v2710_v18 = vadd.f32 %v2706_v0, %v2704_v8  ;;  %v4049_v26 = vpop.eup %4048 }
 0x905   :  { %v4051_v34 = vpop.eup %4050  ;;  %v2714_v36 = vsub.f32 1.0, %v4049_v26  ;;  %v2718_v45 = vmul.f32 %v4049_v26, %v4921_v40 }
 0x906   :  { %v2711_v24 = vadd.f32 %v2707_v30, %v2705_v16  ;;  %4052 = vtanh.f32 %v2710_v18  ;;  %v2715_v43 = vsub.f32 1.0, %v4051_v34  ;;  %v2719_v54 = vmul.f32 %v4051_v34, %v4923_v50 }
 0x908   :  { %4054 = vtanh.f32 %v2711_v24 }
 0x910   :  { %v4053_v37 = vpop.eup %4052 }
 0x911   :  { %v2716_v31 = vmul.f32 %v4053_v37, %v2714_v36 }
 0x912   :  { %v4055_v46 = vpop.eup %4054 }
 0x913   :  { %v2717_v52 = vmul.f32 %v4055_v46, %v2715_v43  ;;  %v2720_v55 = vadd.f32 %v2718_v45, %v2716_v31 }
 0x915   :  { %v2721_v61 = vadd.f32 %v2719_v54, %v2717_v52  ;;  %2722 = vst [vmem:[#allocation3 + $0x7] sm:$0x1] %v2720_v55 }
 0x917   :  { %2723 = vst [vmem:[#allocation3 + $0xf] sm:$0x1] %v2721_v61  ;;  %v2726_v63 = vcombine.low %v2720_v55, %v2721_v61 }
 0x919   :  { %v2733_v1 = vrot.slane %v2726_v63, %v4561_v58 }
 0x91b   :  { %2919 = vst.sshfl [vmem:[#allocation17] sm:$0x5 pattern:$0x73625140] %v2733_v1 }
 0x91c   :  { %v2743_v6 = vld [vmem:[#allocation3] sm:$0xff] }
 0x91d   :  { %3395 = vmatprep.mubr.f32.mxu0 %v2743_v6 }
 0x91e   :  { %v2744_v7 = vld [vmem:[#allocation3 + $0x8] sm:$0xff] }
 0x91f   :  { %3396 = vmatmul.mubr.f32.vlgmr.msra.gmra.mrb[16].mxu0 %v2744_v7 }
 0x920   :  { %4222 = shalt.err (!%p4219_p4)
}
 0x921   :  { %s4223_s26 = scalar_lea.hbm %s4979_s8, 32 }
 0x922   :  { %p4224_p5 = scmp.ne.s32.totalorder %s4979_s8, %s4223_s26  ;;  %p4227_p6 = scmp.lt.u32.totalorder %s4223_s26, %s4979_s8 }
 0x924   :  { %p4229_p7 = pnand %p4227_p6, %p4224_p5 }
 0x926   :  { %4232 = shalt.err (!%p4229_p7)
}
 0x927   :  { %2866 = dma.vmem_to_hbm [thread:$0]  %s2864_s22, 32, %s4979_s8, [#allocation18]   ;;  %v2920_v58 = vld [vmem:[#allocation15] ss:$0 sm:$0xff] }
 0x928   :  { %s4283_s2 = smov [#allocation16]  }
 0x929   :  { %s2850_s10 = sshll.u32 %s4283_s2, 4  ;;  %s2851_s10 = int_to_ptr.vmem [resolvable:$true] %s2850_s10 }
 0x92a   :  { %s4233_s12 = scalar_lea.vmem %s2851_s10, 256  ;;  %p4238_p9 = scmp.lt.s32.totalorder %s2851_s10, %s2851_s10 }
 0x92b   :  { %p4234_p8 = scmp.ne.s32.totalorder %s2851_s10, %s4233_s12  ;;  %p4239_p10 = scmp.lt.s32.totalorder %s4233_s12, %s4233_s12 }
 0x92d   :  { %p4240_p11 = por %p4239_p10, %p4238_p9 }
 0x92f   :  { %p4241_p12 = pnand %p4240_p11, %p4234_p8 }
 0x9f2   :  { %v3397_v40 = vpop.f32.mrb[16].mxu0 }
 0x9f3   :  { %v2840_v50 = vadd.f32 %v3397_v40, %v2920_v58  ;;  %v2834_v13 = vpop.f32.mrb[17].mxu0 }
 0x9f4   :  { %v2835_v17 = vadd.f32 %v2920_v58, %v2834_v13 }
 0x9f5   :  { %2844 = vst [vmem:[#allocation16 + $0x8] sm:$0xff] %v2840_v50 }
 0x9f6   :  { %2843 = vst [vmem:[#allocation16] sm:$0xff] %v2835_v17 }
 0x9f7   :  { %4244 = shalt.err (!%p4241_p12)
}
 0x9f8   :  { %s4245_s8 = scalar_lea.hbm %s4978_s7, 256 }
 0x9f9   :  { %p4246_p13 = scmp.ne.s32.totalorder %s4978_s7, %s4245_s8  ;;  %p4249_p0 = scmp.lt.u32.totalorder %s4245_s8, %s4978_s7 }
 0x9fb   :  { %p4251_p1 = pnand %p4249_p0, %p4246_p13 }
 0x9fd   :  { %4254 = shalt.err (!%p4251_p1)
}
 0x9fe   :  { %2856 = dma.vmem_to_hbm [thread:$0]  %s2851_s10, 256, %s4978_s7, [#allocation6], %s4271_s30, %s4271_s30, %s4272_s19  }
 0x9ff   :  { %4263 = dma.done.wait [#allocation6], 256  }
 0xa00   :  { %4264 = vsyncadd [#allocation6], 4294967040 }
 0xa01   :  { %4265 = dma.done.wait [#allocation18], 32  }
 0xa02   :  { %4266 = vsyncadd [#allocation18], 4294967264 }
 0xa03   :  { %2873 = vsyncpa [#allocation5], 1 }
 0xa04   :  { %2874 = vsyncpa [#allocation8], 1 }
 0xa05   :  { %2875 = vsyncpa [#allocation11], 1 }
 0xa06   :  { %2876 = vsyncpa [#allocation14], 1 }
 0xa07   :  { %2877 = vsyncpa [#allocation6], 1 }
 0xa08   :  { %2878 = vsyncpa [#allocation18], 1 }

</bundles_post_ra>
